<compile_context>
chip_gen: v7x
topology: tpu7x:2x2x1
jax: 0.10.0
libtpu: 0.0.40
codegen_flags: <defaults>
</compile_context>

<pallas_src>
import functools

import jax
import jax.numpy as jnp
from jax.experimental import pallas as pl
from jax.experimental.pallas import tpu as pltpu


# ----------------------------------------------------------------------------
# Shared layout helpers (wrapper-side, cheap XLA glue)
# ----------------------------------------------------------------------------
def _flatten_rowpad(x):
    """(N, C, H, W) -> (N, C, (H+2)*W + 2): zero rows top/bottom, flatten rows,
    plus one zero guard element on each end.  Column padding is handled in-kernel
    with boundary masks, so every 3x3 tap becomes a plain 1-D lane shift."""
    N, C, H, W = x.shape
    xp = jnp.pad(x.astype(jnp.float32), ((0, 0), (0, 0), (1, 1), (0, 0)))
    xp = xp.reshape(N, C, (H + 2) * W)
    return jnp.pad(xp, ((0, 0), (0, 0), (1, 1)))


def _col_masks(H, W):
    """(2, H*W) f32: row 0 zeroes column x==0 (left taps), row 1 zeroes x==W-1."""
    col = jnp.arange(H * W, dtype=jnp.int32) % W
    return jnp.stack([(col != 0), (col != W - 1)]).astype(jnp.float32)


# ----------------------------------------------------------------------------
# Kernel 1: image normalization  out = 2*(x/255) - 1
#   Flat (rows, lanes) layout: lanes a multiple of 128, rows tiled in multiples
#   of 8 so every vreg is fully dense on both sublanes and lanes.
# ----------------------------------------------------------------------------
def _normalize_kernel(x_ref, o_ref):
    o_ref[...] = 2.0 * (x_ref[...] * (1.0 / 255.0)) - 1.0


def normalize_image(img):
    orig_shape = img.shape
    total = 1
    for s in orig_shape:
        total *= int(s)
    # lane-dense factorization
    lane = None
    for cand in (2048, 1024, 512, 256, 128):
        if total % cand == 0:
            lane = cand
            break
    if lane is None:                      # fallback: whole array as one row block
        lane = total
    rows = total // lane
    flat = img.astype(jnp.float32).reshape(rows, lane)

    # row tile: divides rows, stays a multiple of 8, keeps blocks <= ~2 MiB
    tile_r = rows
    if rows % 8 == 0:
        while tile_r * lane * 4 > (2 << 20) and tile_r % 16 == 0:
            tile_r //= 2

    out = pl.pallas_call(
        _normalize_kernel,
        out_shape=jax.ShapeDtypeStruct((rows, lane), jnp.float32),
        grid=(rows // tile_r,),
        in_specs=[pl.BlockSpec((tile_r, lane), lambda i: (i, 0))],
        out_specs=pl.BlockSpec((tile_r, lane), lambda i: (i, 0)),
        compiler_params=pltpu.CompilerParams(dimension_semantics=("parallel",)),
    )(flat)
    return out.reshape(orig_shape)


# ----------------------------------------------------------------------------
# Kernel 2: 3x3 conv (padding=1) on relu(x) as a single MXU matmul
#   x_ref    : (1, Cin, L)      flattened row-padded input, L=(H+2)*W+2
#   cmask_ref: (2, H*W)         column-boundary masks (left / right taps)
#   w_ref    : (Cout, 9*Cin)    bf16, tap-major flattened weights
#   b_ref    : (Cout, 1)
#   o_ref    : (1, Cout, H*W)
#   cols_ref : (9*Cin, H*W)     bf16 VMEM scratch holding the in-kernel im2col
# ----------------------------------------------------------------------------
def _conv3x3_kernel(x_ref, cmask_ref, w_ref, b_ref, o_ref, cols_ref, *, H, W,
                    apply_relu):
    HW = H * W
    cin = x_ref.shape[1]
    x = x_ref[0]                                        # (Cin, L) f32
    if apply_relu:
        x = jnp.maximum(x, 0.0)                         # relu once, before the taps
    left = cmask_ref[0:1, :]
    right = cmask_ref[1:2, :]
    for ky in range(3):
        for kx in range(3):
            t = x[:, ky * W + kx: ky * W + kx + HW]     # (Cin, HW) lane shift
            if kx == 0:
                t = t * left                            # kill row wrap-around
            elif kx == 2:
                t = t * right
            k = ky * 3 + kx
            cols_ref[k * cin:(k + 1) * cin, :] = t.astype(cols_ref.dtype)
    acc = jnp.dot(w_ref[...], cols_ref[...],            # one K=9*Cin MXU pass
                  preferred_element_type=jnp.float32)
    o_ref[0] = acc + b_ref[...]


def conv3x3_relu(x, weight, bias):
    # x: (N, Cin, H, W), weight: (Cout, Cin, 3, 3), bias: (Cout,)
    N, Cin, H, W = x.shape
    Cout = weight.shape[0]
    HW = H * W
    L = (H + 2) * W + 2
    xf = _flatten_rowpad(x)                                        # (N, Cin, L)
    # tap-major flattening:  w_flat[co, k*Cin + ci] = weight[co, ci, ky, kx]
    w_flat = jnp.transpose(weight, (0, 2, 3, 1)).reshape(Cout, 9 * Cin)
    w_flat = w_flat.astype(jnp.bfloat16)
    b2 = bias.reshape(Cout, 1).astype(jnp.float32)
    cmask = _col_masks(H, W)

    out = pl.pallas_call(
        functools.partial(_conv3x3_kernel, H=H, W=W, apply_relu=True),
        out_shape=jax.ShapeDtypeStruct((N, Cout, HW), jnp.float32),
        grid=(N,),
        in_specs=[
            pl.BlockSpec((1, Cin, L), lambda i: (i, 0, 0)),
            pl.BlockSpec((2, HW), lambda i: (0, 0)),
            pl.BlockSpec((Cout, 9 * Cin), lambda i: (0, 0)),
            pl.BlockSpec((Cout, 1), lambda i: (0, 0)),
        ],
        out_specs=pl.BlockSpec((1, Cout, HW), lambda i: (i, 0, 0)),
        scratch_shapes=[pltpu.VMEM((9 * Cin, HW), jnp.bfloat16)],
        compiler_params=pltpu.CompilerParams(dimension_semantics=("parallel",)),
    )(xf, cmask, w_flat, b2)
    return out.reshape(N, Cout, H, W)


# ----------------------------------------------------------------------------
# Kernel 3: fused convex upsample of [disp, sigma, mu, w]  (+ inline disp)
#   mask_ref : (1, 9, F2, HW)   raw up_mask, softmaxed once over the 9 taps
#   field_ref: (1, 3G, L)       flattened row-padded [sigma, mu, w]
#   cmask_ref: (2, HW)
#   o_ref    : (1, 1+3G, F2, HW)  channels: [disp, sigma(G), mu(G), w(G)]
#   disp_ref : (1, 1, HW)         low-resolution disp = sum(w*mu)
# ----------------------------------------------------------------------------
def _fused_upsample_kernel(mask_ref, field_ref, cmask_ref, o_ref, disp_ref, *,
                           G, H, W, factor):
    HW = H * W
    F2 = factor * factor

    # softmax over the 9 taps (computed once per batch, shared by all fields)
    m = mask_ref[0]                                     # (9, F2, HW)
    m_max = jnp.max(m, axis=0, keepdims=True)
    e = jnp.exp(m - m_max)
    denom = jnp.sum(e, axis=0, keepdims=True)
    m_sm = e * pl.reciprocal(denom, approx=True)        # EUP slot, VALU stays free

    f = field_ref[0]                                    # (3G, L)  [sigma, mu, w]
    mu_f = f[G:2 * G]
    w_f = f[2 * G:3 * G]
    disp_f = jnp.sum(w_f * mu_f, axis=0, keepdims=True)  # (1, L) inline disp
    s = float(factor)

    # low-res disp output (un-padded centre of the flattened row-padded layout)
    disp_ref[0] = disp_f[:, W + 1: W + 1 + HW]

    left = cmask_ref[0:1, :]
    right = cmask_ref[1:2, :]

    def upsample_group(xg):                             # xg: (d, L) already scaled
        d = xg.shape[0]
        acc = jnp.zeros((d, F2, HW), jnp.float32)
        for ky in range(3):
            for kx in range(3):
                patch = xg[:, ky * W + kx: ky * W + kx + HW]   # (d, HW)
                if kx == 0:
                    patch = patch * left
                elif kx == 2:
                    patch = patch * right
                k = ky * 3 + kx
                acc = acc + m_sm[k][None] * patch[:, None]
        return acc

    # disp is upsampled with scale=True
    o_ref[0, 0:1] = upsample_group(disp_f * s)

    # sigma & mu use scale=True, w uses scale=False -> per-row scale via 2-D iota
    row_idx = jax.lax.broadcasted_iota(jnp.float32, (3 * G, 1), 0)
    row_scale = jnp.where(row_idx < float(2 * G), s, 1.0)        # (3G, 1)
    o_ref[0, 1:1 + 3 * G] = upsample_group(f * row_scale)


def fused_convex_upsample(up_mask, w, mu, sigma, n_downsample):
    """Returns (disp_lowres, disp_up, mu_up, sigma_up, w_up) matching the PyTorch
    convex_upsample calls in PCVNet.forward (mask is 9-major: view(n,1,9,f,f,h,w))."""
    N, G, H, W = w.shape
    factor = 2 ** n_downsample
    F2 = factor * factor
    HW = H * W
    L = (H + 2) * W + 2
    D = 1 + 3 * G

    mask_r = up_mask.reshape(N, 9, F2, HW).astype(jnp.float32)
    fields = _flatten_rowpad(jnp.concatenate(
        [sigma.astype(jnp.float32), mu.astype(jnp.float32), w.astype(jnp.float32)],
        axis=1))                                                  # (N, 3G, L)
    cmask = _col_masks(H, W)

    ups, disp_lr = pl.pallas_call(
        functools.partial(_fused_upsample_kernel, G=G, H=H, W=W, factor=factor),
        out_shape=(jax.ShapeDtypeStruct((N, D, F2, HW), jnp.float32),
                   jax.ShapeDtypeStruct((N, 1, HW), jnp.float32)),
        grid=(N,),
        in_specs=[
            pl.BlockSpec((1, 9, F2, HW), lambda i: (i, 0, 0, 0)),
            pl.BlockSpec((1, 3 * G, L), lambda i: (i, 0, 0)),
            pl.BlockSpec((2, HW), lambda i: (0, 0)),
        ],
        out_specs=(pl.BlockSpec((1, D, F2, HW), lambda i: (i, 0, 0, 0)),
                   pl.BlockSpec((1, 1, HW), lambda i: (i, 0, 0))),
        compiler_params=pltpu.CompilerParams(dimension_semantics=("parallel",)),
    )(mask_r, fields, cmask)

    def to_fullres(a):       # (S, D, F2, HW) -> (S, D, H*f, W*f)  (torch permute)
        S, Dd = a.shape[:2]
        a = a.reshape(S, Dd, factor, factor, H, W)
        a = jnp.transpose(a, (0, 1, 4, 2, 5, 3))
        return a.reshape(S, Dd, factor * H, factor * W)

    Hf, Wf = factor * H, factor * W
    disp_up = to_fullres(ups[:, 0:1])
    sigma_up = to_fullres(ups[:, 1:1 + G]).reshape(N * G, 1, Hf, Wf)
    mu_up = to_fullres(ups[:, 1 + G:1 + 2 * G]).reshape(N * G, 1, Hf, Wf)
    w_up = to_fullres(ups[:, 1 + 2 * G:1 + 3 * G]).reshape(N * G, 1, Hf, Wf)
    disp = disp_lr.reshape(N, 1, H, W)
    return disp, disp_up, mu_up, sigma_up, w_up


# ----------------------------------------------------------------------------
# Driver: truncated PCVNet forward (iters collapsed to one pass; external
# submodules replaced by deterministic synthetic tensors — see TODOs on top).
# ----------------------------------------------------------------------------
if __name__ == "__main__":
    key = jax.random.PRNGKey(0)

    # args-equivalent config (small, but lane-dense: 1/4-res H*W = 1024)
    N = 2
    n_downsample = 2
    factor = 2 ** n_downsample
    gauss_num = 2
    n_gru_layers = 3
    hidden_dims = [16, 16, 16]
    context_dims = hidden_dims
    init_mu = [8.0, 24.0]
    init_sigma = 16.0
    H_img = W_img = 128
    H, W = H_img // factor, W_img // factor           # 1/(2**n_downsample)-res maps

    keys = jax.random.split(key, 16)
    image1 = jax.random.uniform(keys[0], (N, 3, H_img, W_img), minval=0.0, maxval=255.0)
    image2 = jax.random.uniform(keys[1], (N, 3, H_img, W_img), minval=0.0, maxval=255.0)

    # --- defined: image normalization (Pallas, one call for both images) ---
    imgs_n = normalize_image(jnp.concatenate([image1, image2], axis=0))
    img1n, img2n = jnp.split(imgs_n, 2, axis=0)

    # TODO(synk): cnet (MultiBasicEncoder) / conv2 are external; synthesize their
    # multi-scale context features deterministically.
    cnet_feats = []
    for i in range(n_gru_layers):
        h_i, w_i = H // (2 ** i), W // (2 ** i)
        f0 = jax.random.normal(keys[2 + 2 * i], (N, hidden_dims[i], h_i, w_i))
        f1 = jax.random.normal(keys[3 + 2 * i], (N, context_dims[i], h_i, w_i))
        cnet_feats.append((f0, f1))

    net_list = [jnp.tanh(f0) for f0, _ in cnet_feats]   # elementwise glue (FDM input)

    # --- defined: context_zqr_convs on relu(context) (Pallas single-matmul conv) ---
    inp_list = []
    conv_checks = []
    for i in range(n_gru_layers):
        cin, cout = context_dims[i], hidden_dims[i] * 3
        wkey, bkey = jax.random.split(keys[8 + i])
        weight = jax.random.normal(wkey, (cout, cin, 3, 3)) * 0.05
        bias = jax.random.normal(bkey, (cout,)) * 0.01
        zqr = conv3x3_relu(cnet_feats[i][1], weight, bias)
        inp_list.append(jnp.split(zqr, 3, axis=1))      # z, q, r chunks
        conv_checks.append((cnet_feats[i][1], weight, bias, zqr))

    # --- defined: sigma / w / mu initialization from forward() ---
    sigma = jnp.ones((N, gauss_num, H, W), jnp.float32) * init_sigma / factor
    w = jnp.ones((N, gauss_num, H, W), jnp.float32) / gauss_num
    # TODO(synk): coords_grid / CorrBlock1D / FDM iterations are external; mu stands
    # in as the initial per-gaussian disparity scaled to 1/2**n_downsample res.
    mu = jnp.broadcast_to(
        (jnp.asarray(init_mu, jnp.float32) / factor)[None, :, None, None],
        (N, gauss_num, H, W))

    # TODO(synk): up_mask is normally produced by FDM (must be 9-major over the
    # channel dim, matching view(n,1,9,f,f,h,w)); deterministic stand-in here.
    up_mask = jax.random.normal(keys[12], (N, factor * factor * 9, H, W))

    # --- defined: disp = sum(w*mu) + convex_upsample of disp/sigma/mu/w,
    #     all fused into one Pallas kernel ---
    disp, disp_up, mu_up, sigma_up, w_up = fused_convex_upsample(
        up_mask, w, mu, sigma, n_downsample)

    # TODO(synk): refineNet is undefined in the provided source; refined_disp_up skipped.
    results = (img1n, img2n, net_list, inp_list, disp, disp_up, mu_up, sigma_up, w_up)
    jax.block_until_ready(jax.tree_util.tree_leaves(results))

    # shape checks
    assert disp.shape == (N, 1, H, W)
    assert disp_up.shape == (N, 1, H_img, W_img)
    assert mu_up.shape == (N * gauss_num, 1, H_img, W_img)
    assert sigma_up.shape == (N * gauss_num, 1, H_img, W_img)
    assert w_up.shape == (N * gauss_num, 1, H_img, W_img)

    # light numerical checks
    norm_ref = 2.0 * (image1 / 255.0) - 1.0
    assert float(jnp.max(jnp.abs(img1n - norm_ref))) < 1e-5

    feat, wt, bs, zqr = conv_checks[0]
    ref = jax.lax.conv_general_dilated(
        jnp.maximum(feat.astype(jnp.float32), 0.0), wt.astype(jnp.float32),
        window_strides=(1, 1), padding="SAME",
        dimension_numbers=("NCHW", "OIHW", "NCHW"),
        precision=jax.lax.Precision.HIGHEST) + bs[None, :, None, None]
    assert float(jnp.max(jnp.abs(ref - zqr))) < 5e-2       # bf16-operand tolerance
    # convex upsample of the constant w field (=0.5) must stay ~0.5 away from borders
    interior = w_up[:, :, 2 * factor:-2 * factor, 2 * factor:-2 * factor]
    assert float(jnp.max(jnp.abs(interior - 0.5))) < 1e-2  # approx-reciprocal tolerance

    print("KERNEL_OK")
</pallas_src>

<mosaic_0001>
module attributes {stable_mosaic.version = 11 : i64} {
  func.func @_normalize_kernel(%arg0: i32, %arg1: memref<96x2048xf32, #tpu.memory_space<vmem>>, %arg2: memref<96x2048xf32, #tpu.memory_space<vmem>>) attributes {dimension_semantics = [#tpu.dimension_semantics<parallel>], iteration_bounds = array<i64: 1>, scalar_prefetch = 0 : i64, scratch_operands = 0 : i64, tpu.core_type = #tpu.core_type<tc>, window_params = [{transform_indices = @transform_0, window_bounds = array<i64: 96, 2048>}, {transform_indices = @transform_1, window_bounds = array<i64: 96, 2048>}]} {
    %c0 = arith.constant 0 : index
    %c0_0 = arith.constant 0 : index
    %0 = vector.load %arg1[%c0, %c0_0] : memref<96x2048xf32, #tpu.memory_space<vmem>>, vector<96x2048xf32>
    %cst = arith.constant 0.00392156886 : f32
    %1 = vector.broadcast %cst : f32 to vector<96x2048xf32>
    %2 = arith.mulf %0, %1 : vector<96x2048xf32>
    %cst_1 = arith.constant 2.000000e+00 : f32
    %3 = vector.broadcast %cst_1 : f32 to vector<96x2048xf32>
    %4 = arith.mulf %3, %2 : vector<96x2048xf32>
    %cst_2 = arith.constant 1.000000e+00 : f32
    %5 = vector.broadcast %cst_2 : f32 to vector<96x2048xf32>
    %6 = arith.subf %4, %5 : vector<96x2048xf32>
    %c0_3 = arith.constant 0 : index
    %c0_4 = arith.constant 0 : index
    %7 = vector.load %arg2[%c0_3, %c0_4] : memref<96x2048xf32, #tpu.memory_space<vmem>>, vector<96x2048xf32>
    tpu.vector_store %arg2[%c0_3, %c0_4], %6 {strides = array<i32>} : memref<96x2048xf32, #tpu.memory_space<vmem>>, vector<96x2048xf32>,
    return
  }
  func.func @transform_0(%arg0: i32) -> (i32, i32) {
    %c0_i32 = arith.constant 0 : i32
    %c0_i32_0 = arith.constant 0 : i32
    return %arg0, %c0_i32 : i32, i32
  }
  func.func @transform_1(%arg0: i32) -> (i32, i32) {
    %c0_i32 = arith.constant 0 : i32
    %c0_i32_0 = arith.constant 0 : i32
    return %arg0, %c0_i32 : i32, i32
  }
}

</mosaic_0001>

<bundles_post_ra>
// kernel: tpu_custom_call.1
= control target key start
LH: loop header
LB: loop body
LE: loop exit
PB: predicated region body
PF: predicated region fallthrough
CT: control target
= control target key end

     0   :  { %6 = vsyncpa [#allocation3], 0  ;;  %s1288_s0 = inlined_call_operand.hbm [shape: f32[96,2048], index: 0, kind: input, shape index: {}]   ;;  %s1289_s1 = inlined_call_operand.hbm [shape: f32[96,2048], index: 1, kind: output, shape index: {}]  }
   0x1   :  { %7 = vsyncpa [#allocation4], 0  ;;  %s1244_s6 = smov [#allocation2]   ;;  %s1196_s10 = scalar_lea.hbm %s1288_s0, 24576 }
   0x2   :  { %s13_s7 = sshll.u32 %s1244_s6, 4  ;;  %p1197_p0 = scmp.ne.s32.totalorder %s1288_s0, %s1196_s10  ;;  %s14_s7 = int_to_ptr.vmem [resolvable:$true] %s13_s7 }
   0x3   :  { %p1200_p1 = scmp.lt.u32.totalorder %s1196_s10, %s1288_s0 }
   0x5   :  { %p1202_p2 = pnand %p1200_p1, %p1197_p0 }
   0x7   :  { %1205 = shalt.err (!%p1202_p2)
}
   0x8   :  { %s1206_s15 = scalar_lea.vmem %s14_s7, 24576  ;;  %p1211_p4 = scmp.lt.s32.totalorder %s14_s7, %s14_s7 }
   0x9   :  { %p1207_p3 = scmp.ne.s32.totalorder %s14_s7, %s1206_s15  ;;  %p1212_p5 = scmp.lt.s32.totalorder %s1206_s15, %s1206_s15 }
   0xb   :  { %p1213_p6 = por %p1212_p5, %p1211_p4 }
   0xd   :  { %p1214_p7 = pnand %p1213_p6, %p1207_p3 }
   0xf   :  { %1217 = shalt.err (!%p1214_p7)
}
  0x10   :  { %s1245_s16 = smov 2048   ;;  %s1246_s17 = smov 128  }
  0x11   :  { %19 = dma.hbm_to_vmem [thread:$0]  %s1288_s0, 24576, %s14_s7, [#allocation3], %s1245_s16, %s1245_s16, %s1246_s17  }
  0x12   :  { %1240 = dma.done.wait [#allocation3], 24576  }
  0x13   :  { %1241 = vsyncadd [#allocation3], 4294942720  ;;  %v23_v0 = vld [vmem:[#allocation2] sm:$0xff]  ;;  %v24_v1 = vld [vmem:[#allocation2 + $0x8] sm:$0xff]  ;;  %s1247_s0 = smov [#allocation5]  }
  0x14   :  { %v25_v2 = vld [vmem:[#allocation2 + $0x10] sm:$0xff]  ;;  %v215_v3 = vmul.f32 0.003921569, %v23_v0  ;;  %v216_v4 = vmul.f32 0.003921569, %v24_v1  ;;  %v26_v6 = vld [vmem:[#allocation2 + $0x18] sm:$0xff] }
  0x15   :  { %v217_v5 = vmul.f32 0.003921569, %v25_v2  ;;  %v27_v7 = vld [vmem:[#allocation2 + $0x20] sm:$0xff]  ;;  %v28_v8 = vld [vmem:[#allocation2 + $0x28] sm:$0xff]  ;;  %v218_v12 = vmul.f32 0.003921569, %v26_v6 }
  0x16   :  { %v407_v9 = vmul.f32 2.0, %v215_v3  ;;  %v408_v10 = vmul.f32 2.0, %v216_v4  ;;  %v29_v13 = vld [vmem:[#allocation2 + $0x30] sm:$0xff]  ;;  %v219_v14 = vmul.f32 0.003921569, %v27_v7  ;;  %v30_v21 = vld [vmem:[#allocation2 + $0x38] sm:$0xff] }
  0x17   :  { %v409_v11 = vmul.f32 2.0, %v217_v5  ;;  %v220_v15 = vmul.f32 0.003921569, %v28_v8  ;;  %v221_v16 = vmul.f32 0.003921569, %v29_v13  ;;  %v410_v20 = vmul.f32 2.0, %v218_v12 }
  0x18   :  { %v1000_v17 = vadd.f32 -1.0, %v407_v9  ;;  %v1001_v18 = vadd.f32 -1.0, %v408_v10  ;;  %v31_v22 = vld [vmem:[#allocation2 + $0x40] sm:$0xff]  ;;  %v411_v23 = vmul.f32 2.0, %v219_v14  ;;  %v222_v26 = vmul.f32 0.003921569, %v30_v21 }
  0x19   :  { %v1002_v19 = vadd.f32 -1.0, %v409_v11  ;;  %v412_v24 = vmul.f32 2.0, %v220_v15  ;;  %v413_v25 = vmul.f32 2.0, %v221_v16  ;;  %v32_v27 = vld [vmem:[#allocation2 + $0x48] sm:$0xff]  ;;  %v1003_v28 = vadd.f32 -1.0, %v410_v20  ;;  %v33_v31 = vld [vmem:[#allocation2 + $0x50] sm:$0xff] }
  0x1a   :  { %791 = vst [vmem:[#allocation5] sm:$0xff] %v1000_v17  ;;  %792 = vst [vmem:[#allocation5 + $0x8] sm:$0xff] %v1001_v18  ;;  %v223_v29 = vmul.f32 0.003921569, %v31_v22  ;;  %v224_v30 = vmul.f32 0.003921569, %v32_v27 }
  0x1b   :  { %793 = vst [vmem:[#allocation5 + $0x10] sm:$0xff] %v1002_v19  ;;  %v1004_v32 = vadd.f32 -1.0, %v411_v23  ;;  %v1005_v33 = vadd.f32 -1.0, %v412_v24  ;;  %v1006_v34 = vadd.f32 -1.0, %v413_v25  ;;  %v414_v35 = vmul.f32 2.0, %v222_v26  ;;  %v34_v36 = vld [vmem:[#allocation2 + $0x58] sm:$0xff] }
  0x1c   :  { %v35_v37 = vld [vmem:[#allocation2 + $0x60] sm:$0xff]  ;;  %794 = vst [vmem:[#allocation5 + $0x18] sm:$0xff] %v1003_v28  ;;  %v415_v38 = vmul.f32 2.0, %v223_v29  ;;  %v416_v39 = vmul.f32 2.0, %v224_v30  ;;  %v225_v40 = vmul.f32 0.003921569, %v33_v31 }
  0x1d   :  { %v226_v41 = vmul.f32 0.003921569, %v34_v36  ;;  %795 = vst [vmem:[#allocation5 + $0x20] sm:$0xff] %v1004_v32  ;;  %796 = vst [vmem:[#allocation5 + $0x28] sm:$0xff] %v1005_v33  ;;  %v1007_v42 = vadd.f32 -1.0, %v414_v35  ;;  %v36_v44 = vld [vmem:[#allocation2 + $0x68] sm:$0xff] }
  0x1e   :  { %797 = vst [vmem:[#allocation5 + $0x30] sm:$0xff] %v1006_v34  ;;  %v227_v43 = vmul.f32 0.003921569, %v35_v37  ;;  %v37_v45 = vld [vmem:[#allocation2 + $0x70] sm:$0xff]  ;;  %v38_v46 = vld [vmem:[#allocation2 + $0x78] sm:$0xff]  ;;  %v1008_v47 = vadd.f32 -1.0, %v415_v38 }
  0x1f   :  { %v1009_v48 = vadd.f32 -1.0, %v416_v39  ;;  %v417_v49 = vmul.f32 2.0, %v225_v40  ;;  %v418_v50 = vmul.f32 2.0, %v226_v41  ;;  %v39_v51 = vld [vmem:[#allocation2 + $0x80] sm:$0xff]  ;;  %v40_v52 = vld [vmem:[#allocation2 + $0x88] sm:$0xff]  ;;  %798 = vst [vmem:[#allocation5 + $0x38] sm:$0xff] %v1007_v42 }
  0x20   :  { %v419_v53 = vmul.f32 2.0, %v227_v43  ;;  %v228_v54 = vmul.f32 0.003921569, %v36_v44  ;;  %v229_v55 = vmul.f32 0.003921569, %v37_v45  ;;  %v41_v56 = vld [vmem:[#allocation2 + $0x90] sm:$0xff] }
  0x21   :  { %799 = vst [vmem:[#allocation5 + $0x40] sm:$0xff] %v1008_v47  ;;  %800 = vst [vmem:[#allocation5 + $0x48] sm:$0xff] %v1009_v48  ;;  %v1010_v57 = vadd.f32 -1.0, %v417_v49  ;;  %v1011_v58 = vadd.f32 -1.0, %v418_v50  ;;  %v230_v59 = vmul.f32 0.003921569, %v38_v46 }
  0x22   :  { %v231_v60 = vmul.f32 0.003921569, %v39_v51  ;;  %v1012_v61 = vadd.f32 -1.0, %v419_v53  ;;  %v420_v62 = vmul.f32 2.0, %v228_v54  ;;  %v421_v63 = vmul.f32 2.0, %v229_v55  ;;  %v42_v1 = vld [vmem:[#allocation2 + $0x98] sm:$0xff] }
  0x23   :  { %v232_v0 = vmul.f32 0.003921569, %v40_v52  ;;  %801 = vst [vmem:[#allocation5 + $0x50] sm:$0xff] %v1010_v57  ;;  %802 = vst [vmem:[#allocation5 + $0x58] sm:$0xff] %v1011_v58  ;;  %v422_v2 = vmul.f32 2.0, %v230_v59  ;;  %v43_v9 = vld [vmem:[#allocation2 + $0xa0] sm:$0xff] }
  0x24   :  { %v423_v3 = vmul.f32 2.0, %v231_v60  ;;  %v233_v4 = vmul.f32 0.003921569, %v41_v56  ;;  %v234_v5 = vmul.f32 0.003921569, %v42_v1  ;;  %803 = vst [vmem:[#allocation5 + $0x60] sm:$0xff] %v1012_v61 }
  0x25   :  { %v1013_v6 = vadd.f32 -1.0, %v420_v62  ;;  %v1014_v7 = vadd.f32 -1.0, %v421_v63  ;;  %v424_v8 = vmul.f32 2.0, %v232_v0  ;;  %v44_v10 = vld [vmem:[#allocation2 + $0xa8] sm:$0xff]  ;;  %v45_v11 = vld [vmem:[#allocation2 + $0xb0] sm:$0xff]  ;;  %v1015_v12 = vadd.f32 -1.0, %v422_v2 }
  0x26   :  { %v1016_v13 = vadd.f32 -1.0, %v423_v3  ;;  %v425_v14 = vmul.f32 2.0, %v233_v4  ;;  %v426_v15 = vmul.f32 2.0, %v234_v5  ;;  %v46_v16 = vld [vmem:[#allocation2 + $0xb8] sm:$0xff]  ;;  %v47_v17 = vld [vmem:[#allocation2 + $0xc0] sm:$0xff]  ;;  %v48_v21 = vld [vmem:[#allocation2 + $0xc8] sm:$0xff] }
  0x27   :  { %804 = vst [vmem:[#allocation5 + $0x68] sm:$0xff] %v1013_v6  ;;  %805 = vst [vmem:[#allocation5 + $0x70] sm:$0xff] %v1014_v7  ;;  %v1017_v18 = vadd.f32 -1.0, %v424_v8  ;;  %v235_v19 = vmul.f32 0.003921569, %v43_v9  ;;  %v49_v32 = vld [vmem:[#allocation2 + $0xd0] sm:$0xff] }
  0x28   :  { %v236_v20 = vmul.f32 0.003921569, %v44_v10  ;;  %806 = vst [vmem:[#allocation5 + $0x78] sm:$0xff] %v1015_v12  ;;  %807 = vst [vmem:[#allocation5 + $0x80] sm:$0xff] %v1016_v13  ;;  %v1018_v22 = vadd.f32 -1.0, %v425_v14  ;;  %v1019_v23 = vadd.f32 -1.0, %v426_v15 }
  0x29   :  { %v237_v24 = vmul.f32 0.003921569, %v45_v11  ;;  %v238_v25 = vmul.f32 0.003921569, %v46_v16  ;;  %808 = vst [vmem:[#allocation5 + $0x88] sm:$0xff] %v1017_v18  ;;  %v427_v26 = vmul.f32 2.0, %v235_v19 }
  0x2a   :  { %v428_v27 = vmul.f32 2.0, %v236_v20  ;;  %v239_v28 = vmul.f32 0.003921569, %v47_v17  ;;  %v240_v29 = vmul.f32 0.003921569, %v48_v21  ;;  %809 = vst [vmem:[#allocation5 + $0x90] sm:$0xff] %v1018_v22 }
  0x2b   :  { %810 = vst [vmem:[#allocation5 + $0x98] sm:$0xff] %v1019_v23  ;;  %v429_v30 = vmul.f32 2.0, %v237_v24  ;;  %v430_v31 = vmul.f32 2.0, %v238_v25  ;;  %v50_v33 = vld [vmem:[#allocation2 + $0xd8] sm:$0xff]  ;;  %v51_v34 = vld [vmem:[#allocation2 + $0xe0] sm:$0xff]  ;;  %v1020_v35 = vadd.f32 -1.0, %v427_v26 }
  0x2c   :  { %v1021_v36 = vadd.f32 -1.0, %v428_v27  ;;  %v431_v37 = vmul.f32 2.0, %v239_v28  ;;  %v432_v38 = vmul.f32 2.0, %v240_v29  ;;  %v52_v39 = vld [vmem:[#allocation2 + $0xe8] sm:$0xff]  ;;  %v53_v40 = vld [vmem:[#allocation2 + $0xf0] sm:$0xff]  ;;  %v54_v52 = vld [vmem:[#allocation2 + $0xf8] sm:$0xff] }
  0x2d   :  { %v1022_v41 = vadd.f32 -1.0, %v429_v30  ;;  %v1023_v42 = vadd.f32 -1.0, %v430_v31  ;;  %v241_v43 = vmul.f32 0.003921569, %v49_v32  ;;  %v242_v44 = vmul.f32 0.003921569, %v50_v33 }
  0x2e   :  { %811 = vst [vmem:[#allocation5 + $0xa0] sm:$0xff] %v1020_v35  ;;  %812 = vst [vmem:[#allocation5 + $0xa8] sm:$0xff] %v1021_v36  ;;  %v1024_v45 = vadd.f32 -1.0, %v431_v37  ;;  %v1025_v46 = vadd.f32 -1.0, %v432_v38  ;;  %v243_v47 = vmul.f32 0.003921569, %v51_v34 }
  0x2f   :  { %v244_v48 = vmul.f32 0.003921569, %v52_v39  ;;  %813 = vst [vmem:[#allocation5 + $0xb0] sm:$0xff] %v1022_v41  ;;  %814 = vst [vmem:[#allocation5 + $0xb8] sm:$0xff] %v1023_v42  ;;  %v433_v49 = vmul.f32 2.0, %v241_v43  ;;  %v434_v50 = vmul.f32 2.0, %v242_v44 }
  0x30   :  { %v245_v51 = vmul.f32 0.003921569, %v53_v40  ;;  %v55_v53 = vld [vmem:[#allocation2 + $0x100] sm:$0xff]  ;;  %815 = vst [vmem:[#allocation5 + $0xc0] sm:$0xff] %v1024_v45  ;;  %816 = vst [vmem:[#allocation5 + $0xc8] sm:$0xff] %v1025_v46  ;;  %v435_v54 = vmul.f32 2.0, %v243_v47 }
  0x31   :  { %v436_v55 = vmul.f32 2.0, %v244_v48  ;;  %v246_v56 = vmul.f32 0.003921569, %v54_v52  ;;  %v247_v57 = vmul.f32 0.003921569, %v55_v53  ;;  %v1026_v58 = vadd.f32 -1.0, %v433_v49 }
  0x32   :  { %v1027_v59 = vadd.f32 -1.0, %v434_v50  ;;  %v437_v60 = vmul.f32 2.0, %v245_v51  ;;  %v56_v61 = vld [vmem:[#allocation2 + $0x108] sm:$0xff]  ;;  %v57_v62 = vld [vmem:[#allocation2 + $0x110] sm:$0xff]  ;;  %v58_v63 = vld [vmem:[#allocation2 + $0x118] sm:$0xff]  ;;  %v1028_v0 = vadd.f32 -1.0, %v435_v54 }
  0x33   :  { %v1029_v1 = vadd.f32 -1.0, %v436_v55  ;;  %v438_v2 = vmul.f32 2.0, %v246_v56  ;;  %v439_v3 = vmul.f32 2.0, %v247_v57  ;;  %v59_v4 = vld [vmem:[#allocation2 + $0x120] sm:$0xff]  ;;  %v60_v5 = vld [vmem:[#allocation2 + $0x128] sm:$0xff]  ;;  %817 = vst [vmem:[#allocation5 + $0xd0] sm:$0xff] %v1026_v58 }
  0x34   :  { %818 = vst [vmem:[#allocation5 + $0xd8] sm:$0xff] %v1027_v59  ;;  %v1030_v6 = vadd.f32 -1.0, %v437_v60  ;;  %v248_v7 = vmul.f32 0.003921569, %v56_v61  ;;  %v249_v8 = vmul.f32 0.003921569, %v57_v62 }
  0x35   :  { %v61_v9 = vld [vmem:[#allocation2 + $0x130] sm:$0xff]  ;;  %819 = vst [vmem:[#allocation5 + $0xe0] sm:$0xff] %v1028_v0  ;;  %820 = vst [vmem:[#allocation5 + $0xe8] sm:$0xff] %v1029_v1  ;;  %v1031_v10 = vadd.f32 -1.0, %v438_v2  ;;  %v1032_v11 = vadd.f32 -1.0, %v439_v3  ;;  %v62_v20 = vld [vmem:[#allocation2 + $0x138] sm:$0xff] }
  0x36   :  { %v250_v12 = vmul.f32 0.003921569, %v58_v63  ;;  %v251_v13 = vmul.f32 0.003921569, %v59_v4  ;;  %821 = vst [vmem:[#allocation5 + $0xf0] sm:$0xff] %v1030_v6  ;;  %v440_v14 = vmul.f32 2.0, %v248_v7 }
  0x37   :  { %v441_v15 = vmul.f32 2.0, %v249_v8  ;;  %v252_v16 = vmul.f32 0.003921569, %v60_v5  ;;  %v253_v17 = vmul.f32 0.003921569, %v61_v9  ;;  %822 = vst [vmem:[#allocation5 + $0xf8] sm:$0xff] %v1031_v10 }
  0x38   :  { %823 = vst [vmem:[#allocation5 + $0x100] sm:$0xff] %v1032_v11  ;;  %v442_v18 = vmul.f32 2.0, %v250_v12  ;;  %v443_v19 = vmul.f32 2.0, %v251_v13  ;;  %v63_v21 = vld [vmem:[#allocation2 + $0x140] sm:$0xff]  ;;  %v64_v22 = vld [vmem:[#allocation2 + $0x148] sm:$0xff]  ;;  %v1033_v23 = vadd.f32 -1.0, %v440_v14 }
  0x39   :  { %v1034_v24 = vadd.f32 -1.0, %v441_v15  ;;  %v444_v25 = vmul.f32 2.0, %v252_v16  ;;  %v445_v26 = vmul.f32 2.0, %v253_v17  ;;  %v65_v27 = vld [vmem:[#allocation2 + $0x150] sm:$0xff]  ;;  %v66_v28 = vld [vmem:[#allocation2 + $0x158] sm:$0xff]  ;;  %v67_v40 = vld [vmem:[#allocation2 + $0x160] sm:$0xff] }
  0x3a   :  { %v1035_v29 = vadd.f32 -1.0, %v442_v18  ;;  %v1036_v30 = vadd.f32 -1.0, %v443_v19  ;;  %v254_v31 = vmul.f32 0.003921569, %v62_v20  ;;  %v255_v32 = vmul.f32 0.003921569, %v63_v21 }
  0x3b   :  { %824 = vst [vmem:[#allocation5 + $0x108] sm:$0xff] %v1033_v23  ;;  %825 = vst [vmem:[#allocation5 + $0x110] sm:$0xff] %v1034_v24  ;;  %v1037_v33 = vadd.f32 -1.0, %v444_v25  ;;  %v1038_v34 = vadd.f32 -1.0, %v445_v26  ;;  %v256_v35 = vmul.f32 0.003921569, %v64_v22 }
  0x3c   :  { %v257_v36 = vmul.f32 0.003921569, %v65_v27  ;;  %826 = vst [vmem:[#allocation5 + $0x118] sm:$0xff] %v1035_v29  ;;  %827 = vst [vmem:[#allocation5 + $0x120] sm:$0xff] %v1036_v30  ;;  %v446_v37 = vmul.f32 2.0, %v254_v31  ;;  %v447_v38 = vmul.f32 2.0, %v255_v32 }
  0x3d   :  { %v258_v39 = vmul.f32 0.003921569, %v66_v28  ;;  %v68_v41 = vld [vmem:[#allocation2 + $0x168] sm:$0xff]  ;;  %828 = vst [vmem:[#allocation5 + $0x128] sm:$0xff] %v1037_v33  ;;  %829 = vst [vmem:[#allocation5 + $0x130] sm:$0xff] %v1038_v34  ;;  %v448_v42 = vmul.f32 2.0, %v256_v35 }
  0x3e   :  { %v449_v43 = vmul.f32 2.0, %v257_v36  ;;  %v259_v44 = vmul.f32 0.003921569, %v67_v40  ;;  %v260_v45 = vmul.f32 0.003921569, %v68_v41  ;;  %v1039_v46 = vadd.f32 -1.0, %v446_v37 }
  0x3f   :  { %v1040_v47 = vadd.f32 -1.0, %v447_v38  ;;  %v450_v48 = vmul.f32 2.0, %v258_v39  ;;  %v69_v49 = vld [vmem:[#allocation2 + $0x170] sm:$0xff]  ;;  %v70_v50 = vld [vmem:[#allocation2 + $0x178] sm:$0xff]  ;;  %v71_v51 = vld [vmem:[#allocation2 + $0x180] sm:$0xff]  ;;  %v1041_v52 = vadd.f32 -1.0, %v448_v42 }
  0x40   :  { %v1042_v53 = vadd.f32 -1.0, %v449_v43  ;;  %v451_v54 = vmul.f32 2.0, %v259_v44  ;;  %v452_v55 = vmul.f32 2.0, %v260_v45  ;;  %v72_v56 = vld [vmem:[#allocation2 + $0x188] sm:$0xff]  ;;  %v73_v57 = vld [vmem:[#allocation2 + $0x190] sm:$0xff]  ;;  %830 = vst [vmem:[#allocation5 + $0x138] sm:$0xff] %v1039_v46 }
  0x41   :  { %831 = vst [vmem:[#allocation5 + $0x140] sm:$0xff] %v1040_v47  ;;  %v1043_v58 = vadd.f32 -1.0, %v450_v48  ;;  %v261_v59 = vmul.f32 0.003921569, %v69_v49  ;;  %v262_v60 = vmul.f32 0.003921569, %v70_v50 }
  0x42   :  { %v74_v61 = vld [vmem:[#allocation2 + $0x198] sm:$0xff]  ;;  %832 = vst [vmem:[#allocation5 + $0x148] sm:$0xff] %v1041_v52  ;;  %833 = vst [vmem:[#allocation5 + $0x150] sm:$0xff] %v1042_v53  ;;  %v1044_v62 = vadd.f32 -1.0, %v451_v54  ;;  %v1045_v63 = vadd.f32 -1.0, %v452_v55  ;;  %v75_v8 = vld [vmem:[#allocation2 + $0x1a0] sm:$0xff] }
  0x43   :  { %v263_v0 = vmul.f32 0.003921569, %v71_v51  ;;  %v264_v1 = vmul.f32 0.003921569, %v72_v56  ;;  %834 = vst [vmem:[#allocation5 + $0x158] sm:$0xff] %v1043_v58  ;;  %v453_v2 = vmul.f32 2.0, %v261_v59 }
  0x44   :  { %v454_v3 = vmul.f32 2.0, %v262_v60  ;;  %v265_v4 = vmul.f32 0.003921569, %v73_v57  ;;  %v266_v5 = vmul.f32 0.003921569, %v74_v61  ;;  %835 = vst [vmem:[#allocation5 + $0x160] sm:$0xff] %v1044_v62 }
  0x45   :  { %836 = vst [vmem:[#allocation5 + $0x168] sm:$0xff] %v1045_v63  ;;  %v455_v6 = vmul.f32 2.0, %v263_v0  ;;  %v456_v7 = vmul.f32 2.0, %v264_v1  ;;  %v76_v9 = vld [vmem:[#allocation2 + $0x1a8] sm:$0xff]  ;;  %v77_v10 = vld [vmem:[#allocation2 + $0x1b0] sm:$0xff]  ;;  %v1046_v11 = vadd.f32 -1.0, %v453_v2 }
  0x46   :  { %v1047_v12 = vadd.f32 -1.0, %v454_v3  ;;  %v457_v13 = vmul.f32 2.0, %v265_v4  ;;  %v458_v14 = vmul.f32 2.0, %v266_v5  ;;  %v78_v15 = vld [vmem:[#allocation2 + $0x1b8] sm:$0xff]  ;;  %v79_v16 = vld [vmem:[#allocation2 + $0x1c0] sm:$0xff]  ;;  %v80_v28 = vld [vmem:[#allocation2 + $0x1c8] sm:$0xff] }
  0x47   :  { %v1048_v17 = vadd.f32 -1.0, %v455_v6  ;;  %v1049_v18 = vadd.f32 -1.0, %v456_v7  ;;  %v267_v19 = vmul.f32 0.003921569, %v75_v8  ;;  %v268_v20 = vmul.f32 0.003921569, %v76_v9 }
  0x48   :  { %837 = vst [vmem:[#allocation5 + $0x170] sm:$0xff] %v1046_v11  ;;  %838 = vst [vmem:[#allocation5 + $0x178] sm:$0xff] %v1047_v12  ;;  %v1050_v21 = vadd.f32 -1.0, %v457_v13  ;;  %v1051_v22 = vadd.f32 -1.0, %v458_v14  ;;  %v269_v23 = vmul.f32 0.003921569, %v77_v10 }
  0x49   :  { %v270_v24 = vmul.f32 0.003921569, %v78_v15  ;;  %839 = vst [vmem:[#allocation5 + $0x180] sm:$0xff] %v1048_v17  ;;  %840 = vst [vmem:[#allocation5 + $0x188] sm:$0xff] %v1049_v18  ;;  %v459_v25 = vmul.f32 2.0, %v267_v19  ;;  %v460_v26 = vmul.f32 2.0, %v268_v20 }
  0x4a   :  { %v271_v27 = vmul.f32 0.003921569, %v79_v16  ;;  %v81_v29 = vld [vmem:[#allocation2 + $0x1d0] sm:$0xff]  ;;  %841 = vst [vmem:[#allocation5 + $0x190] sm:$0xff] %v1050_v21  ;;  %842 = vst [vmem:[#allocation5 + $0x198] sm:$0xff] %v1051_v22  ;;  %v461_v30 = vmul.f32 2.0, %v269_v23 }
  0x4b   :  { %v462_v31 = vmul.f32 2.0, %v270_v24  ;;  %v272_v32 = vmul.f32 0.003921569, %v80_v28  ;;  %v273_v33 = vmul.f32 0.003921569, %v81_v29  ;;  %v1052_v34 = vadd.f32 -1.0, %v459_v25 }
  0x4c   :  { %v1053_v35 = vadd.f32 -1.0, %v460_v26  ;;  %v463_v36 = vmul.f32 2.0, %v271_v27  ;;  %v82_v37 = vld [vmem:[#allocation2 + $0x1d8] sm:$0xff]  ;;  %v83_v38 = vld [vmem:[#allocation2 + $0x1e0] sm:$0xff]  ;;  %v84_v39 = vld [vmem:[#allocation2 + $0x1e8] sm:$0xff]  ;;  %v1054_v40 = vadd.f32 -1.0, %v461_v30 }
  0x4d   :  { %v1055_v41 = vadd.f32 -1.0, %v462_v31  ;;  %v464_v42 = vmul.f32 2.0, %v272_v32  ;;  %v465_v43 = vmul.f32 2.0, %v273_v33  ;;  %v85_v44 = vld [vmem:[#allocation2 + $0x1f0] sm:$0xff]  ;;  %v86_v45 = vld [vmem:[#allocation2 + $0x1f8] sm:$0xff]  ;;  %843 = vst [vmem:[#allocation5 + $0x1a0] sm:$0xff] %v1052_v34 }
  0x4e   :  { %844 = vst [vmem:[#allocation5 + $0x1a8] sm:$0xff] %v1053_v35  ;;  %v1056_v46 = vadd.f32 -1.0, %v463_v36  ;;  %v274_v47 = vmul.f32 0.003921569, %v82_v37  ;;  %v275_v48 = vmul.f32 0.003921569, %v83_v38 }
  0x4f   :  { %v87_v49 = vld [vmem:[#allocation2 + $0x200] sm:$0xff]  ;;  %845 = vst [vmem:[#allocation5 + $0x1b0] sm:$0xff] %v1054_v40  ;;  %846 = vst [vmem:[#allocation5 + $0x1b8] sm:$0xff] %v1055_v41  ;;  %v1057_v50 = vadd.f32 -1.0, %v464_v42  ;;  %v1058_v51 = vadd.f32 -1.0, %v465_v43  ;;  %v88_v60 = vld [vmem:[#allocation2 + $0x208] sm:$0xff] }
  0x50   :  { %v276_v52 = vmul.f32 0.003921569, %v84_v39  ;;  %v277_v53 = vmul.f32 0.003921569, %v85_v44  ;;  %847 = vst [vmem:[#allocation5 + $0x1c0] sm:$0xff] %v1056_v46  ;;  %v466_v54 = vmul.f32 2.0, %v274_v47 }
  0x51   :  { %v467_v55 = vmul.f32 2.0, %v275_v48  ;;  %v278_v56 = vmul.f32 0.003921569, %v86_v45  ;;  %v279_v57 = vmul.f32 0.003921569, %v87_v49  ;;  %848 = vst [vmem:[#allocation5 + $0x1c8] sm:$0xff] %v1057_v50 }
  0x52   :  { %849 = vst [vmem:[#allocation5 + $0x1d0] sm:$0xff] %v1058_v51  ;;  %v468_v58 = vmul.f32 2.0, %v276_v52  ;;  %v469_v59 = vmul.f32 2.0, %v277_v53  ;;  %v89_v61 = vld [vmem:[#allocation2 + $0x210] sm:$0xff]  ;;  %v90_v62 = vld [vmem:[#allocation2 + $0x218] sm:$0xff]  ;;  %v1059_v63 = vadd.f32 -1.0, %v466_v54 }
  0x53   :  { %v1060_v0 = vadd.f32 -1.0, %v467_v55  ;;  %v470_v1 = vmul.f32 2.0, %v278_v56  ;;  %v471_v2 = vmul.f32 2.0, %v279_v57  ;;  %v91_v3 = vld [vmem:[#allocation2 + $0x220] sm:$0xff]  ;;  %v92_v4 = vld [vmem:[#allocation2 + $0x228] sm:$0xff]  ;;  %v93_v16 = vld [vmem:[#allocation2 + $0x230] sm:$0xff] }
  0x54   :  { %v1061_v5 = vadd.f32 -1.0, %v468_v58  ;;  %v1062_v6 = vadd.f32 -1.0, %v469_v59  ;;  %v280_v7 = vmul.f32 0.003921569, %v88_v60  ;;  %v281_v8 = vmul.f32 0.003921569, %v89_v61 }
  0x55   :  { %850 = vst [vmem:[#allocation5 + $0x1d8] sm:$0xff] %v1059_v63  ;;  %851 = vst [vmem:[#allocation5 + $0x1e0] sm:$0xff] %v1060_v0  ;;  %v1063_v9 = vadd.f32 -1.0, %v470_v1  ;;  %v1064_v10 = vadd.f32 -1.0, %v471_v2  ;;  %v282_v11 = vmul.f32 0.003921569, %v90_v62 }
  0x56   :  { %v283_v12 = vmul.f32 0.003921569, %v91_v3  ;;  %852 = vst [vmem:[#allocation5 + $0x1e8] sm:$0xff] %v1061_v5  ;;  %853 = vst [vmem:[#allocation5 + $0x1f0] sm:$0xff] %v1062_v6  ;;  %v472_v13 = vmul.f32 2.0, %v280_v7  ;;  %v473_v14 = vmul.f32 2.0, %v281_v8 }
  0x57   :  { %v284_v15 = vmul.f32 0.003921569, %v92_v4  ;;  %v94_v17 = vld [vmem:[#allocation2 + $0x238] sm:$0xff]  ;;  %854 = vst [vmem:[#allocation5 + $0x1f8] sm:$0xff] %v1063_v9  ;;  %855 = vst [vmem:[#allocation5 + $0x200] sm:$0xff] %v1064_v10  ;;  %v474_v18 = vmul.f32 2.0, %v282_v11 }
  0x58   :  { %v475_v19 = vmul.f32 2.0, %v283_v12  ;;  %v285_v20 = vmul.f32 0.003921569, %v93_v16  ;;  %v286_v21 = vmul.f32 0.003921569, %v94_v17  ;;  %v1065_v22 = vadd.f32 -1.0, %v472_v13 }
  0x59   :  { %v1066_v23 = vadd.f32 -1.0, %v473_v14  ;;  %v476_v24 = vmul.f32 2.0, %v284_v15  ;;  %v95_v25 = vld [vmem:[#allocation2 + $0x240] sm:$0xff]  ;;  %v96_v26 = vld [vmem:[#allocation2 + $0x248] sm:$0xff]  ;;  %v97_v27 = vld [vmem:[#allocation2 + $0x250] sm:$0xff]  ;;  %v1067_v28 = vadd.f32 -1.0, %v474_v18 }
  0x5a   :  { %v1068_v29 = vadd.f32 -1.0, %v475_v19  ;;  %v477_v30 = vmul.f32 2.0, %v285_v20  ;;  %v478_v31 = vmul.f32 2.0, %v286_v21  ;;  %v98_v32 = vld [vmem:[#allocation2 + $0x258] sm:$0xff]  ;;  %v99_v33 = vld [vmem:[#allocation2 + $0x260] sm:$0xff]  ;;  %856 = vst [vmem:[#allocation5 + $0x208] sm:$0xff] %v1065_v22 }
  0x5b   :  { %857 = vst [vmem:[#allocation5 + $0x210] sm:$0xff] %v1066_v23  ;;  %v1069_v34 = vadd.f32 -1.0, %v476_v24  ;;  %v287_v35 = vmul.f32 0.003921569, %v95_v25  ;;  %v288_v36 = vmul.f32 0.003921569, %v96_v26 }
  0x5c   :  { %v100_v37 = vld [vmem:[#allocation2 + $0x268] sm:$0xff]  ;;  %858 = vst [vmem:[#allocation5 + $0x218] sm:$0xff] %v1067_v28  ;;  %859 = vst [vmem:[#allocation5 + $0x220] sm:$0xff] %v1068_v29  ;;  %v1070_v38 = vadd.f32 -1.0, %v477_v30  ;;  %v1071_v39 = vadd.f32 -1.0, %v478_v31  ;;  %v101_v48 = vld [vmem:[#allocation2 + $0x270] sm:$0xff] }
  0x5d   :  { %v289_v40 = vmul.f32 0.003921569, %v97_v27  ;;  %v290_v41 = vmul.f32 0.003921569, %v98_v32  ;;  %860 = vst [vmem:[#allocation5 + $0x228] sm:$0xff] %v1069_v34  ;;  %v479_v42 = vmul.f32 2.0, %v287_v35 }
  0x5e   :  { %v480_v43 = vmul.f32 2.0, %v288_v36  ;;  %v291_v44 = vmul.f32 0.003921569, %v99_v33  ;;  %v292_v45 = vmul.f32 0.003921569, %v100_v37  ;;  %861 = vst [vmem:[#allocation5 + $0x230] sm:$0xff] %v1070_v38 }
  0x5f   :  { %862 = vst [vmem:[#allocation5 + $0x238] sm:$0xff] %v1071_v39  ;;  %v481_v46 = vmul.f32 2.0, %v289_v40  ;;  %v482_v47 = vmul.f32 2.0, %v290_v41  ;;  %v102_v49 = vld [vmem:[#allocation2 + $0x278] sm:$0xff]  ;;  %v103_v50 = vld [vmem:[#allocation2 + $0x280] sm:$0xff]  ;;  %v1072_v51 = vadd.f32 -1.0, %v479_v42 }
  0x60   :  { %v1073_v52 = vadd.f32 -1.0, %v480_v43  ;;  %v483_v53 = vmul.f32 2.0, %v291_v44  ;;  %v484_v54 = vmul.f32 2.0, %v292_v45  ;;  %v104_v55 = vld [vmem:[#allocation2 + $0x288] sm:$0xff]  ;;  %v105_v56 = vld [vmem:[#allocation2 + $0x290] sm:$0xff]  ;;  %v106_v4 = vld [vmem:[#allocation2 + $0x298] sm:$0xff] }
  0x61   :  { %v1074_v57 = vadd.f32 -1.0, %v481_v46  ;;  %v1075_v58 = vadd.f32 -1.0, %v482_v47  ;;  %v293_v59 = vmul.f32 0.003921569, %v101_v48  ;;  %v294_v60 = vmul.f32 0.003921569, %v102_v49 }
  0x62   :  { %863 = vst [vmem:[#allocation5 + $0x240] sm:$0xff] %v1072_v51  ;;  %864 = vst [vmem:[#allocation5 + $0x248] sm:$0xff] %v1073_v52  ;;  %v1076_v61 = vadd.f32 -1.0, %v483_v53  ;;  %v1077_v62 = vadd.f32 -1.0, %v484_v54  ;;  %v295_v63 = vmul.f32 0.003921569, %v103_v50 }
  0x63   :  { %v296_v0 = vmul.f32 0.003921569, %v104_v55  ;;  %865 = vst [vmem:[#allocation5 + $0x250] sm:$0xff] %v1074_v57  ;;  %866 = vst [vmem:[#allocation5 + $0x258] sm:$0xff] %v1075_v58  ;;  %v485_v1 = vmul.f32 2.0, %v293_v59  ;;  %v486_v2 = vmul.f32 2.0, %v294_v60 }
  0x64   :  { %v297_v3 = vmul.f32 0.003921569, %v105_v56  ;;  %v107_v5 = vld [vmem:[#allocation2 + $0x2a0] sm:$0xff]  ;;  %867 = vst [vmem:[#allocation5 + $0x260] sm:$0xff] %v1076_v61  ;;  %868 = vst [vmem:[#allocation5 + $0x268] sm:$0xff] %v1077_v62  ;;  %v487_v6 = vmul.f32 2.0, %v295_v63 }
  0x65   :  { %v488_v7 = vmul.f32 2.0, %v296_v0  ;;  %v298_v8 = vmul.f32 0.003921569, %v106_v4  ;;  %v299_v9 = vmul.f32 0.003921569, %v107_v5  ;;  %v1078_v10 = vadd.f32 -1.0, %v485_v1 }
  0x66   :  { %v1079_v11 = vadd.f32 -1.0, %v486_v2  ;;  %v489_v12 = vmul.f32 2.0, %v297_v3  ;;  %v108_v13 = vld [vmem:[#allocation2 + $0x2a8] sm:$0xff]  ;;  %v109_v14 = vld [vmem:[#allocation2 + $0x2b0] sm:$0xff]  ;;  %v110_v15 = vld [vmem:[#allocation2 + $0x2b8] sm:$0xff]  ;;  %v1080_v16 = vadd.f32 -1.0, %v487_v6 }
  0x67   :  { %v1081_v17 = vadd.f32 -1.0, %v488_v7  ;;  %v490_v18 = vmul.f32 2.0, %v298_v8  ;;  %v491_v19 = vmul.f32 2.0, %v299_v9  ;;  %v111_v20 = vld [vmem:[#allocation2 + $0x2c0] sm:$0xff]  ;;  %v112_v21 = vld [vmem:[#allocation2 + $0x2c8] sm:$0xff]  ;;  %869 = vst [vmem:[#allocation5 + $0x270] sm:$0xff] %v1078_v10 }
  0x68   :  { %870 = vst [vmem:[#allocation5 + $0x278] sm:$0xff] %v1079_v11  ;;  %v1082_v22 = vadd.f32 -1.0, %v489_v12  ;;  %v300_v23 = vmul.f32 0.003921569, %v108_v13  ;;  %v301_v24 = vmul.f32 0.003921569, %v109_v14 }
  0x69   :  { %v113_v25 = vld [vmem:[#allocation2 + $0x2d0] sm:$0xff]  ;;  %871 = vst [vmem:[#allocation5 + $0x280] sm:$0xff] %v1080_v16  ;;  %872 = vst [vmem:[#allocation5 + $0x288] sm:$0xff] %v1081_v17  ;;  %v1083_v26 = vadd.f32 -1.0, %v490_v18  ;;  %v1084_v27 = vadd.f32 -1.0, %v491_v19  ;;  %v114_v36 = vld [vmem:[#allocation2 + $0x2d8] sm:$0xff] }
  0x6a   :  { %v302_v28 = vmul.f32 0.003921569, %v110_v15  ;;  %v303_v29 = vmul.f32 0.003921569, %v111_v20  ;;  %873 = vst [vmem:[#allocation5 + $0x290] sm:$0xff] %v1082_v22  ;;  %v492_v30 = vmul.f32 2.0, %v300_v23 }
  0x6b   :  { %v493_v31 = vmul.f32 2.0, %v301_v24  ;;  %v304_v32 = vmul.f32 0.003921569, %v112_v21  ;;  %v305_v33 = vmul.f32 0.003921569, %v113_v25  ;;  %874 = vst [vmem:[#allocation5 + $0x298] sm:$0xff] %v1083_v26 }
  0x6c   :  { %875 = vst [vmem:[#allocation5 + $0x2a0] sm:$0xff] %v1084_v27  ;;  %v494_v34 = vmul.f32 2.0, %v302_v28  ;;  %v495_v35 = vmul.f32 2.0, %v303_v29  ;;  %v115_v37 = vld [vmem:[#allocation2 + $0x2e0] sm:$0xff]  ;;  %v116_v38 = vld [vmem:[#allocation2 + $0x2e8] sm:$0xff]  ;;  %v1085_v39 = vadd.f32 -1.0, %v492_v30 }
  0x6d   :  { %v1086_v40 = vadd.f32 -1.0, %v493_v31  ;;  %v496_v41 = vmul.f32 2.0, %v304_v32  ;;  %v497_v42 = vmul.f32 2.0, %v305_v33  ;;  %v117_v43 = vld [vmem:[#allocation2 + $0x2f0] sm:$0xff]  ;;  %v118_v44 = vld [vmem:[#allocation2 + $0x2f8] sm:$0xff]  ;;  %v119_v56 = vld [vmem:[#allocation2 + $0x300] sm:$0xff] }
  0x6e   :  { %v1087_v45 = vadd.f32 -1.0, %v494_v34  ;;  %v1088_v46 = vadd.f32 -1.0, %v495_v35  ;;  %v306_v47 = vmul.f32 0.003921569, %v114_v36  ;;  %v307_v48 = vmul.f32 0.003921569, %v115_v37 }
  0x6f   :  { %876 = vst [vmem:[#allocation5 + $0x2a8] sm:$0xff] %v1085_v39  ;;  %877 = vst [vmem:[#allocation5 + $0x2b0] sm:$0xff] %v1086_v40  ;;  %v1089_v49 = vadd.f32 -1.0, %v496_v41  ;;  %v1090_v50 = vadd.f32 -1.0, %v497_v42  ;;  %v308_v51 = vmul.f32 0.003921569, %v116_v38 }
  0x70   :  { %v309_v52 = vmul.f32 0.003921569, %v117_v43  ;;  %878 = vst [vmem:[#allocation5 + $0x2b8] sm:$0xff] %v1087_v45  ;;  %879 = vst [vmem:[#allocation5 + $0x2c0] sm:$0xff] %v1088_v46  ;;  %v498_v53 = vmul.f32 2.0, %v306_v47  ;;  %v499_v54 = vmul.f32 2.0, %v307_v48 }
  0x71   :  { %v310_v55 = vmul.f32 0.003921569, %v118_v44  ;;  %v120_v57 = vld [vmem:[#allocation2 + $0x308] sm:$0xff]  ;;  %880 = vst [vmem:[#allocation5 + $0x2c8] sm:$0xff] %v1089_v49  ;;  %881 = vst [vmem:[#allocation5 + $0x2d0] sm:$0xff] %v1090_v50  ;;  %v500_v58 = vmul.f32 2.0, %v308_v51 }
  0x72   :  { %v501_v59 = vmul.f32 2.0, %v309_v52  ;;  %v311_v60 = vmul.f32 0.003921569, %v119_v56  ;;  %v312_v61 = vmul.f32 0.003921569, %v120_v57  ;;  %v1091_v62 = vadd.f32 -1.0, %v498_v53 }
  0x73   :  { %v1092_v63 = vadd.f32 -1.0, %v499_v54  ;;  %v502_v0 = vmul.f32 2.0, %v310_v55  ;;  %v121_v1 = vld [vmem:[#allocation2 + $0x310] sm:$0xff]  ;;  %v122_v2 = vld [vmem:[#allocation2 + $0x318] sm:$0xff]  ;;  %v123_v3 = vld [vmem:[#allocation2 + $0x320] sm:$0xff]  ;;  %v1093_v4 = vadd.f32 -1.0, %v500_v58 }
  0x74   :  { %v1094_v5 = vadd.f32 -1.0, %v501_v59  ;;  %v503_v6 = vmul.f32 2.0, %v311_v60  ;;  %v504_v7 = vmul.f32 2.0, %v312_v61  ;;  %v124_v8 = vld [vmem:[#allocation2 + $0x328] sm:$0xff]  ;;  %v125_v9 = vld [vmem:[#allocation2 + $0x330] sm:$0xff]  ;;  %882 = vst [vmem:[#allocation5 + $0x2d8] sm:$0xff] %v1091_v62 }
  0x75   :  { %883 = vst [vmem:[#allocation5 + $0x2e0] sm:$0xff] %v1092_v63  ;;  %v1095_v10 = vadd.f32 -1.0, %v502_v0  ;;  %v313_v11 = vmul.f32 0.003921569, %v121_v1  ;;  %v314_v12 = vmul.f32 0.003921569, %v122_v2 }
  0x76   :  { %v126_v13 = vld [vmem:[#allocation2 + $0x338] sm:$0xff]  ;;  %884 = vst [vmem:[#allocation5 + $0x2e8] sm:$0xff] %v1093_v4  ;;  %885 = vst [vmem:[#allocation5 + $0x2f0] sm:$0xff] %v1094_v5  ;;  %v1096_v14 = vadd.f32 -1.0, %v503_v6  ;;  %v1097_v15 = vadd.f32 -1.0, %v504_v7  ;;  %v127_v24 = vld [vmem:[#allocation2 + $0x340] sm:$0xff] }
  0x77   :  { %v315_v16 = vmul.f32 0.003921569, %v123_v3  ;;  %v316_v17 = vmul.f32 0.003921569, %v124_v8  ;;  %886 = vst [vmem:[#allocation5 + $0x2f8] sm:$0xff] %v1095_v10  ;;  %v505_v18 = vmul.f32 2.0, %v313_v11 }
  0x78   :  { %v506_v19 = vmul.f32 2.0, %v314_v12  ;;  %v317_v20 = vmul.f32 0.003921569, %v125_v9  ;;  %v318_v21 = vmul.f32 0.003921569, %v126_v13  ;;  %887 = vst [vmem:[#allocation5 + $0x300] sm:$0xff] %v1096_v14 }
  0x79   :  { %888 = vst [vmem:[#allocation5 + $0x308] sm:$0xff] %v1097_v15  ;;  %v507_v22 = vmul.f32 2.0, %v315_v16  ;;  %v508_v23 = vmul.f32 2.0, %v316_v17  ;;  %v128_v25 = vld [vmem:[#allocation2 + $0x348] sm:$0xff]  ;;  %v129_v26 = vld [vmem:[#allocation2 + $0x350] sm:$0xff]  ;;  %v1098_v27 = vadd.f32 -1.0, %v505_v18 }
  0x7a   :  { %v1099_v28 = vadd.f32 -1.0, %v506_v19  ;;  %v509_v29 = vmul.f32 2.0, %v317_v20  ;;  %v510_v30 = vmul.f32 2.0, %v318_v21  ;;  %v130_v31 = vld [vmem:[#allocation2 + $0x358] sm:$0xff]  ;;  %v131_v32 = vld [vmem:[#allocation2 + $0x360] sm:$0xff]  ;;  %v132_v44 = vld [vmem:[#allocation2 + $0x368] sm:$0xff] }
  0x7b   :  { %v1100_v33 = vadd.f32 -1.0, %v507_v22  ;;  %v1101_v34 = vadd.f32 -1.0, %v508_v23  ;;  %v319_v35 = vmul.f32 0.003921569, %v127_v24  ;;  %v320_v36 = vmul.f32 0.003921569, %v128_v25 }
  0x7c   :  { %889 = vst [vmem:[#allocation5 + $0x310] sm:$0xff] %v1098_v27  ;;  %890 = vst [vmem:[#allocation5 + $0x318] sm:$0xff] %v1099_v28  ;;  %v1102_v37 = vadd.f32 -1.0, %v509_v29  ;;  %v1103_v38 = vadd.f32 -1.0, %v510_v30  ;;  %v321_v39 = vmul.f32 0.003921569, %v129_v26 }
  0x7d   :  { %v322_v40 = vmul.f32 0.003921569, %v130_v31  ;;  %891 = vst [vmem:[#allocation5 + $0x320] sm:$0xff] %v1100_v33  ;;  %892 = vst [vmem:[#allocation5 + $0x328] sm:$0xff] %v1101_v34  ;;  %v511_v41 = vmul.f32 2.0, %v319_v35  ;;  %v512_v42 = vmul.f32 2.0, %v320_v36 }
  0x7e   :  { %v323_v43 = vmul.f32 0.003921569, %v131_v32  ;;  %v133_v45 = vld [vmem:[#allocation2 + $0x370] sm:$0xff]  ;;  %893 = vst [vmem:[#allocation5 + $0x330] sm:$0xff] %v1102_v37  ;;  %894 = vst [vmem:[#allocation5 + $0x338] sm:$0xff] %v1103_v38  ;;  %v513_v46 = vmul.f32 2.0, %v321_v39 }
  0x7f   :  { %v514_v47 = vmul.f32 2.0, %v322_v40  ;;  %v324_v48 = vmul.f32 0.003921569, %v132_v44  ;;  %v325_v49 = vmul.f32 0.003921569, %v133_v45  ;;  %v1104_v50 = vadd.f32 -1.0, %v511_v41 }
  0x80   :  { %v1105_v51 = vadd.f32 -1.0, %v512_v42  ;;  %v515_v52 = vmul.f32 2.0, %v323_v43  ;;  %v134_v53 = vld [vmem:[#allocation2 + $0x378] sm:$0xff]  ;;  %v135_v54 = vld [vmem:[#allocation2 + $0x380] sm:$0xff]  ;;  %v136_v55 = vld [vmem:[#allocation2 + $0x388] sm:$0xff]  ;;  %v1106_v56 = vadd.f32 -1.0, %v513_v46 }
  0x81   :  { %v1107_v57 = vadd.f32 -1.0, %v514_v47  ;;  %v516_v58 = vmul.f32 2.0, %v324_v48  ;;  %v517_v59 = vmul.f32 2.0, %v325_v49  ;;  %v137_v60 = vld [vmem:[#allocation2 + $0x390] sm:$0xff]  ;;  %v138_v61 = vld [vmem:[#allocation2 + $0x398] sm:$0xff]  ;;  %895 = vst [vmem:[#allocation5 + $0x340] sm:$0xff] %v1104_v50 }
  0x82   :  { %896 = vst [vmem:[#allocation5 + $0x348] sm:$0xff] %v1105_v51  ;;  %v1108_v62 = vadd.f32 -1.0, %v515_v52  ;;  %v326_v63 = vmul.f32 0.003921569, %v134_v53  ;;  %v327_v0 = vmul.f32 0.003921569, %v135_v54 }
  0x83   :  { %v139_v1 = vld [vmem:[#allocation2 + $0x3a0] sm:$0xff]  ;;  %897 = vst [vmem:[#allocation5 + $0x350] sm:$0xff] %v1106_v56  ;;  %898 = vst [vmem:[#allocation5 + $0x358] sm:$0xff] %v1107_v57  ;;  %v1109_v2 = vadd.f32 -1.0, %v516_v58  ;;  %v1110_v3 = vadd.f32 -1.0, %v517_v59  ;;  %v140_v12 = vld [vmem:[#allocation2 + $0x3a8] sm:$0xff] }
  0x84   :  { %v328_v4 = vmul.f32 0.003921569, %v136_v55  ;;  %v329_v5 = vmul.f32 0.003921569, %v137_v60  ;;  %899 = vst [vmem:[#allocation5 + $0x360] sm:$0xff] %v1108_v62  ;;  %v518_v6 = vmul.f32 2.0, %v326_v63 }
  0x85   :  { %v519_v7 = vmul.f32 2.0, %v327_v0  ;;  %v330_v8 = vmul.f32 0.003921569, %v138_v61  ;;  %v331_v9 = vmul.f32 0.003921569, %v139_v1  ;;  %900 = vst [vmem:[#allocation5 + $0x368] sm:$0xff] %v1109_v2 }
  0x86   :  { %901 = vst [vmem:[#allocation5 + $0x370] sm:$0xff] %v1110_v3  ;;  %v520_v10 = vmul.f32 2.0, %v328_v4  ;;  %v521_v11 = vmul.f32 2.0, %v329_v5  ;;  %v141_v13 = vld [vmem:[#allocation2 + $0x3b0] sm:$0xff]  ;;  %v142_v14 = vld [vmem:[#allocation2 + $0x3b8] sm:$0xff]  ;;  %v1111_v15 = vadd.f32 -1.0, %v518_v6 }
  0x87   :  { %v1112_v16 = vadd.f32 -1.0, %v519_v7  ;;  %v522_v17 = vmul.f32 2.0, %v330_v8  ;;  %v523_v18 = vmul.f32 2.0, %v331_v9  ;;  %v143_v19 = vld [vmem:[#allocation2 + $0x3c0] sm:$0xff]  ;;  %v144_v20 = vld [vmem:[#allocation2 + $0x3c8] sm:$0xff]  ;;  %v145_v32 = vld [vmem:[#allocation2 + $0x3d0] sm:$0xff] }
  0x88   :  { %v1113_v21 = vadd.f32 -1.0, %v520_v10  ;;  %v1114_v22 = vadd.f32 -1.0, %v521_v11  ;;  %v332_v23 = vmul.f32 0.003921569, %v140_v12  ;;  %v333_v24 = vmul.f32 0.003921569, %v141_v13 }
  0x89   :  { %902 = vst [vmem:[#allocation5 + $0x378] sm:$0xff] %v1111_v15  ;;  %903 = vst [vmem:[#allocation5 + $0x380] sm:$0xff] %v1112_v16  ;;  %v1115_v25 = vadd.f32 -1.0, %v522_v17  ;;  %v1116_v26 = vadd.f32 -1.0, %v523_v18  ;;  %v334_v27 = vmul.f32 0.003921569, %v142_v14 }
  0x8a   :  { %v335_v28 = vmul.f32 0.003921569, %v143_v19  ;;  %904 = vst [vmem:[#allocation5 + $0x388] sm:$0xff] %v1113_v21  ;;  %905 = vst [vmem:[#allocation5 + $0x390] sm:$0xff] %v1114_v22  ;;  %v524_v29 = vmul.f32 2.0, %v332_v23  ;;  %v525_v30 = vmul.f32 2.0, %v333_v24 }
  0x8b   :  { %v336_v31 = vmul.f32 0.003921569, %v144_v20  ;;  %v146_v33 = vld [vmem:[#allocation2 + $0x3d8] sm:$0xff]  ;;  %906 = vst [vmem:[#allocation5 + $0x398] sm:$0xff] %v1115_v25  ;;  %907 = vst [vmem:[#allocation5 + $0x3a0] sm:$0xff] %v1116_v26  ;;  %v526_v34 = vmul.f32 2.0, %v334_v27 }
  0x8c   :  { %v527_v35 = vmul.f32 2.0, %v335_v28  ;;  %v337_v36 = vmul.f32 0.003921569, %v145_v32  ;;  %v338_v37 = vmul.f32 0.003921569, %v146_v33  ;;  %v1117_v38 = vadd.f32 -1.0, %v524_v29 }
  0x8d   :  { %v1118_v39 = vadd.f32 -1.0, %v525_v30  ;;  %v528_v40 = vmul.f32 2.0, %v336_v31  ;;  %v147_v41 = vld [vmem:[#allocation2 + $0x3e0] sm:$0xff]  ;;  %v148_v42 = vld [vmem:[#allocation2 + $0x3e8] sm:$0xff]  ;;  %v149_v43 = vld [vmem:[#allocation2 + $0x3f0] sm:$0xff]  ;;  %v1119_v44 = vadd.f32 -1.0, %v526_v34 }
  0x8e   :  { %v1120_v45 = vadd.f32 -1.0, %v527_v35  ;;  %v529_v46 = vmul.f32 2.0, %v337_v36  ;;  %v530_v47 = vmul.f32 2.0, %v338_v37  ;;  %v150_v48 = vld [vmem:[#allocation2 + $0x3f8] sm:$0xff]  ;;  %v151_v49 = vld [vmem:[#allocation2 + $0x400] sm:$0xff]  ;;  %908 = vst [vmem:[#allocation5 + $0x3a8] sm:$0xff] %v1117_v38 }
  0x8f   :  { %909 = vst [vmem:[#allocation5 + $0x3b0] sm:$0xff] %v1118_v39  ;;  %v1121_v50 = vadd.f32 -1.0, %v528_v40  ;;  %v339_v51 = vmul.f32 0.003921569, %v147_v41  ;;  %v340_v52 = vmul.f32 0.003921569, %v148_v42 }
  0x90   :  { %v152_v53 = vld [vmem:[#allocation2 + $0x408] sm:$0xff]  ;;  %910 = vst [vmem:[#allocation5 + $0x3b8] sm:$0xff] %v1119_v44  ;;  %911 = vst [vmem:[#allocation5 + $0x3c0] sm:$0xff] %v1120_v45  ;;  %v1122_v54 = vadd.f32 -1.0, %v529_v46  ;;  %v1123_v55 = vadd.f32 -1.0, %v530_v47  ;;  %v153_v0 = vld [vmem:[#allocation2 + $0x410] sm:$0xff] }
  0x91   :  { %v341_v56 = vmul.f32 0.003921569, %v149_v43  ;;  %v342_v57 = vmul.f32 0.003921569, %v150_v48  ;;  %912 = vst [vmem:[#allocation5 + $0x3c8] sm:$0xff] %v1121_v50  ;;  %v531_v58 = vmul.f32 2.0, %v339_v51 }
  0x92   :  { %v532_v59 = vmul.f32 2.0, %v340_v52  ;;  %v343_v60 = vmul.f32 0.003921569, %v151_v49  ;;  %v344_v61 = vmul.f32 0.003921569, %v152_v53  ;;  %913 = vst [vmem:[#allocation5 + $0x3d0] sm:$0xff] %v1122_v54 }
  0x93   :  { %914 = vst [vmem:[#allocation5 + $0x3d8] sm:$0xff] %v1123_v55  ;;  %v533_v62 = vmul.f32 2.0, %v341_v56  ;;  %v534_v63 = vmul.f32 2.0, %v342_v57  ;;  %v154_v1 = vld [vmem:[#allocation2 + $0x418] sm:$0xff]  ;;  %v155_v2 = vld [vmem:[#allocation2 + $0x420] sm:$0xff]  ;;  %v1124_v3 = vadd.f32 -1.0, %v531_v58 }
  0x94   :  { %v1125_v4 = vadd.f32 -1.0, %v532_v59  ;;  %v535_v5 = vmul.f32 2.0, %v343_v60  ;;  %v536_v6 = vmul.f32 2.0, %v344_v61  ;;  %v156_v7 = vld [vmem:[#allocation2 + $0x428] sm:$0xff]  ;;  %v157_v8 = vld [vmem:[#allocation2 + $0x430] sm:$0xff]  ;;  %v158_v20 = vld [vmem:[#allocation2 + $0x438] sm:$0xff] }
  0x95   :  { %v1126_v9 = vadd.f32 -1.0, %v533_v62  ;;  %v1127_v10 = vadd.f32 -1.0, %v534_v63  ;;  %v345_v11 = vmul.f32 0.003921569, %v153_v0  ;;  %v346_v12 = vmul.f32 0.003921569, %v154_v1 }
  0x96   :  { %915 = vst [vmem:[#allocation5 + $0x3e0] sm:$0xff] %v1124_v3  ;;  %916 = vst [vmem:[#allocation5 + $0x3e8] sm:$0xff] %v1125_v4  ;;  %v1128_v13 = vadd.f32 -1.0, %v535_v5  ;;  %v1129_v14 = vadd.f32 -1.0, %v536_v6  ;;  %v347_v15 = vmul.f32 0.003921569, %v155_v2 }
  0x97   :  { %v348_v16 = vmul.f32 0.003921569, %v156_v7  ;;  %917 = vst [vmem:[#allocation5 + $0x3f0] sm:$0xff] %v1126_v9  ;;  %918 = vst [vmem:[#allocation5 + $0x3f8] sm:$0xff] %v1127_v10  ;;  %v537_v17 = vmul.f32 2.0, %v345_v11  ;;  %v538_v18 = vmul.f32 2.0, %v346_v12 }
  0x98   :  { %v349_v19 = vmul.f32 0.003921569, %v157_v8  ;;  %v159_v21 = vld [vmem:[#allocation2 + $0x440] sm:$0xff]  ;;  %919 = vst [vmem:[#allocation5 + $0x400] sm:$0xff] %v1128_v13  ;;  %920 = vst [vmem:[#allocation5 + $0x408] sm:$0xff] %v1129_v14  ;;  %v539_v22 = vmul.f32 2.0, %v347_v15 }
  0x99   :  { %v540_v23 = vmul.f32 2.0, %v348_v16  ;;  %v350_v24 = vmul.f32 0.003921569, %v158_v20  ;;  %v351_v25 = vmul.f32 0.003921569, %v159_v21  ;;  %v1130_v26 = vadd.f32 -1.0, %v537_v17 }
  0x9a   :  { %v1131_v27 = vadd.f32 -1.0, %v538_v18  ;;  %v541_v28 = vmul.f32 2.0, %v349_v19  ;;  %v160_v29 = vld [vmem:[#allocation2 + $0x448] sm:$0xff]  ;;  %v161_v30 = vld [vmem:[#allocation2 + $0x450] sm:$0xff]  ;;  %v162_v31 = vld [vmem:[#allocation2 + $0x458] sm:$0xff]  ;;  %v1132_v32 = vadd.f32 -1.0, %v539_v22 }
  0x9b   :  { %v1133_v33 = vadd.f32 -1.0, %v540_v23  ;;  %v542_v34 = vmul.f32 2.0, %v350_v24  ;;  %v543_v35 = vmul.f32 2.0, %v351_v25  ;;  %v163_v36 = vld [vmem:[#allocation2 + $0x460] sm:$0xff]  ;;  %v164_v37 = vld [vmem:[#allocation2 + $0x468] sm:$0xff]  ;;  %921 = vst [vmem:[#allocation5 + $0x410] sm:$0xff] %v1130_v26 }
  0x9c   :  { %922 = vst [vmem:[#allocation5 + $0x418] sm:$0xff] %v1131_v27  ;;  %v1134_v38 = vadd.f32 -1.0, %v541_v28  ;;  %v352_v39 = vmul.f32 0.003921569, %v160_v29  ;;  %v353_v40 = vmul.f32 0.003921569, %v161_v30 }
  0x9d   :  { %v165_v41 = vld [vmem:[#allocation2 + $0x470] sm:$0xff]  ;;  %923 = vst [vmem:[#allocation5 + $0x420] sm:$0xff] %v1132_v32  ;;  %924 = vst [vmem:[#allocation5 + $0x428] sm:$0xff] %v1133_v33  ;;  %v1135_v42 = vadd.f32 -1.0, %v542_v34  ;;  %v1136_v43 = vadd.f32 -1.0, %v543_v35  ;;  %v166_v52 = vld [vmem:[#allocation2 + $0x478] sm:$0xff] }
  0x9e   :  { %v354_v44 = vmul.f32 0.003921569, %v162_v31  ;;  %v355_v45 = vmul.f32 0.003921569, %v163_v36  ;;  %925 = vst [vmem:[#allocation5 + $0x430] sm:$0xff] %v1134_v38  ;;  %v544_v46 = vmul.f32 2.0, %v352_v39 }
  0x9f   :  { %v545_v47 = vmul.f32 2.0, %v353_v40  ;;  %v356_v48 = vmul.f32 0.003921569, %v164_v37  ;;  %v357_v49 = vmul.f32 0.003921569, %v165_v41  ;;  %926 = vst [vmem:[#allocation5 + $0x438] sm:$0xff] %v1135_v42 }
  0xa0   :  { %927 = vst [vmem:[#allocation5 + $0x440] sm:$0xff] %v1136_v43  ;;  %v546_v50 = vmul.f32 2.0, %v354_v44  ;;  %v547_v51 = vmul.f32 2.0, %v355_v45  ;;  %v167_v53 = vld [vmem:[#allocation2 + $0x480] sm:$0xff]  ;;  %v168_v54 = vld [vmem:[#allocation2 + $0x488] sm:$0xff]  ;;  %v1137_v55 = vadd.f32 -1.0, %v544_v46 }
  0xa1   :  { %v1138_v56 = vadd.f32 -1.0, %v545_v47  ;;  %v548_v57 = vmul.f32 2.0, %v356_v48  ;;  %v549_v58 = vmul.f32 2.0, %v357_v49  ;;  %v169_v59 = vld [vmem:[#allocation2 + $0x490] sm:$0xff]  ;;  %v170_v60 = vld [vmem:[#allocation2 + $0x498] sm:$0xff]  ;;  %v171_v8 = vld [vmem:[#allocation2 + $0x4a0] sm:$0xff] }
  0xa2   :  { %v1139_v61 = vadd.f32 -1.0, %v546_v50  ;;  %v1140_v62 = vadd.f32 -1.0, %v547_v51  ;;  %v358_v63 = vmul.f32 0.003921569, %v166_v52  ;;  %v359_v0 = vmul.f32 0.003921569, %v167_v53 }
  0xa3   :  { %928 = vst [vmem:[#allocation5 + $0x448] sm:$0xff] %v1137_v55  ;;  %929 = vst [vmem:[#allocation5 + $0x450] sm:$0xff] %v1138_v56  ;;  %v1141_v1 = vadd.f32 -1.0, %v548_v57  ;;  %v1142_v2 = vadd.f32 -1.0, %v549_v58  ;;  %v360_v3 = vmul.f32 0.003921569, %v168_v54 }
  0xa4   :  { %v361_v4 = vmul.f32 0.003921569, %v169_v59  ;;  %930 = vst [vmem:[#allocation5 + $0x458] sm:$0xff] %v1139_v61  ;;  %931 = vst [vmem:[#allocation5 + $0x460] sm:$0xff] %v1140_v62  ;;  %v550_v5 = vmul.f32 2.0, %v358_v63  ;;  %v551_v6 = vmul.f32 2.0, %v359_v0 }
  0xa5   :  { %v362_v7 = vmul.f32 0.003921569, %v170_v60  ;;  %v172_v9 = vld [vmem:[#allocation2 + $0x4a8] sm:$0xff]  ;;  %932 = vst [vmem:[#allocation5 + $0x468] sm:$0xff] %v1141_v1  ;;  %933 = vst [vmem:[#allocation5 + $0x470] sm:$0xff] %v1142_v2  ;;  %v552_v10 = vmul.f32 2.0, %v360_v3 }
  0xa6   :  { %v553_v11 = vmul.f32 2.0, %v361_v4  ;;  %v363_v12 = vmul.f32 0.003921569, %v171_v8  ;;  %v364_v13 = vmul.f32 0.003921569, %v172_v9  ;;  %v1143_v14 = vadd.f32 -1.0, %v550_v5 }
  0xa7   :  { %v1144_v15 = vadd.f32 -1.0, %v551_v6  ;;  %v554_v16 = vmul.f32 2.0, %v362_v7  ;;  %v173_v17 = vld [vmem:[#allocation2 + $0x4b0] sm:$0xff]  ;;  %v174_v18 = vld [vmem:[#allocation2 + $0x4b8] sm:$0xff]  ;;  %v175_v19 = vld [vmem:[#allocation2 + $0x4c0] sm:$0xff]  ;;  %v1145_v20 = vadd.f32 -1.0, %v552_v10 }
  0xa8   :  { %v1146_v21 = vadd.f32 -1.0, %v553_v11  ;;  %v555_v22 = vmul.f32 2.0, %v363_v12  ;;  %v556_v23 = vmul.f32 2.0, %v364_v13  ;;  %v176_v24 = vld [vmem:[#allocation2 + $0x4c8] sm:$0xff]  ;;  %v177_v25 = vld [vmem:[#allocation2 + $0x4d0] sm:$0xff]  ;;  %934 = vst [vmem:[#allocation5 + $0x478] sm:$0xff] %v1143_v14 }
  0xa9   :  { %935 = vst [vmem:[#allocation5 + $0x480] sm:$0xff] %v1144_v15  ;;  %v1147_v26 = vadd.f32 -1.0, %v554_v16  ;;  %v365_v27 = vmul.f32 0.003921569, %v173_v17  ;;  %v366_v28 = vmul.f32 0.003921569, %v174_v18 }
  0xaa   :  { %v178_v29 = vld [vmem:[#allocation2 + $0x4d8] sm:$0xff]  ;;  %936 = vst [vmem:[#allocation5 + $0x488] sm:$0xff] %v1145_v20  ;;  %937 = vst [vmem:[#allocation5 + $0x490] sm:$0xff] %v1146_v21  ;;  %v1148_v30 = vadd.f32 -1.0, %v555_v22  ;;  %v1149_v31 = vadd.f32 -1.0, %v556_v23  ;;  %v179_v40 = vld [vmem:[#allocation2 + $0x4e0] sm:$0xff] }
  0xab   :  { %v367_v32 = vmul.f32 0.003921569, %v175_v19  ;;  %v368_v33 = vmul.f32 0.003921569, %v176_v24  ;;  %938 = vst [vmem:[#allocation5 + $0x498] sm:$0xff] %v1147_v26  ;;  %v557_v34 = vmul.f32 2.0, %v365_v27 }
  0xac   :  { %v558_v35 = vmul.f32 2.0, %v366_v28  ;;  %v369_v36 = vmul.f32 0.003921569, %v177_v25  ;;  %v370_v37 = vmul.f32 0.003921569, %v178_v29  ;;  %939 = vst [vmem:[#allocation5 + $0x4a0] sm:$0xff] %v1148_v30 }
  0xad   :  { %940 = vst [vmem:[#allocation5 + $0x4a8] sm:$0xff] %v1149_v31  ;;  %v559_v38 = vmul.f32 2.0, %v367_v32  ;;  %v560_v39 = vmul.f32 2.0, %v368_v33  ;;  %v180_v41 = vld [vmem:[#allocation2 + $0x4e8] sm:$0xff]  ;;  %v181_v42 = vld [vmem:[#allocation2 + $0x4f0] sm:$0xff]  ;;  %v1150_v43 = vadd.f32 -1.0, %v557_v34 }
  0xae   :  { %v1151_v44 = vadd.f32 -1.0, %v558_v35  ;;  %v561_v45 = vmul.f32 2.0, %v369_v36  ;;  %v562_v46 = vmul.f32 2.0, %v370_v37  ;;  %v182_v47 = vld [vmem:[#allocation2 + $0x4f8] sm:$0xff]  ;;  %v183_v48 = vld [vmem:[#allocation2 + $0x500] sm:$0xff]  ;;  %v184_v60 = vld [vmem:[#allocation2 + $0x508] sm:$0xff] }
  0xaf   :  { %v1152_v49 = vadd.f32 -1.0, %v559_v38  ;;  %v1153_v50 = vadd.f32 -1.0, %v560_v39  ;;  %v371_v51 = vmul.f32 0.003921569, %v179_v40  ;;  %v372_v52 = vmul.f32 0.003921569, %v180_v41 }
  0xb0   :  { %941 = vst [vmem:[#allocation5 + $0x4b0] sm:$0xff] %v1150_v43  ;;  %942 = vst [vmem:[#allocation5 + $0x4b8] sm:$0xff] %v1151_v44  ;;  %v1154_v53 = vadd.f32 -1.0, %v561_v45  ;;  %v1155_v54 = vadd.f32 -1.0, %v562_v46  ;;  %v373_v55 = vmul.f32 0.003921569, %v181_v42 }
  0xb1   :  { %v374_v56 = vmul.f32 0.003921569, %v182_v47  ;;  %943 = vst [vmem:[#allocation5 + $0x4c0] sm:$0xff] %v1152_v49  ;;  %944 = vst [vmem:[#allocation5 + $0x4c8] sm:$0xff] %v1153_v50  ;;  %v563_v57 = vmul.f32 2.0, %v371_v51  ;;  %v564_v58 = vmul.f32 2.0, %v372_v52 }
  0xb2   :  { %v375_v59 = vmul.f32 0.003921569, %v183_v48  ;;  %v185_v61 = vld [vmem:[#allocation2 + $0x510] sm:$0xff]  ;;  %945 = vst [vmem:[#allocation5 + $0x4d0] sm:$0xff] %v1154_v53  ;;  %946 = vst [vmem:[#allocation5 + $0x4d8] sm:$0xff] %v1155_v54  ;;  %v565_v62 = vmul.f32 2.0, %v373_v55 }
  0xb3   :  { %v566_v63 = vmul.f32 2.0, %v374_v56  ;;  %v376_v0 = vmul.f32 0.003921569, %v184_v60  ;;  %v377_v1 = vmul.f32 0.003921569, %v185_v61  ;;  %v1156_v2 = vadd.f32 -1.0, %v563_v57 }
  0xb4   :  { %v1157_v3 = vadd.f32 -1.0, %v564_v58  ;;  %v567_v4 = vmul.f32 2.0, %v375_v59  ;;  %v186_v5 = vld [vmem:[#allocation2 + $0x518] sm:$0xff]  ;;  %v187_v6 = vld [vmem:[#allocation2 + $0x520] sm:$0xff]  ;;  %v188_v7 = vld [vmem:[#allocation2 + $0x528] sm:$0xff]  ;;  %v1158_v8 = vadd.f32 -1.0, %v565_v62 }
  0xb5   :  { %v1159_v9 = vadd.f32 -1.0, %v566_v63  ;;  %v568_v10 = vmul.f32 2.0, %v376_v0  ;;  %v569_v11 = vmul.f32 2.0, %v377_v1  ;;  %v189_v12 = vld [vmem:[#allocation2 + $0x530] sm:$0xff]  ;;  %v190_v13 = vld [vmem:[#allocation2 + $0x538] sm:$0xff]  ;;  %947 = vst [vmem:[#allocation5 + $0x4e0] sm:$0xff] %v1156_v2 }
  0xb6   :  { %948 = vst [vmem:[#allocation5 + $0x4e8] sm:$0xff] %v1157_v3  ;;  %v1160_v14 = vadd.f32 -1.0, %v567_v4  ;;  %v378_v15 = vmul.f32 0.003921569, %v186_v5  ;;  %v379_v16 = vmul.f32 0.003921569, %v187_v6 }
  0xb7   :  { %v191_v17 = vld [vmem:[#allocation2 + $0x540] sm:$0xff]  ;;  %949 = vst [vmem:[#allocation5 + $0x4f0] sm:$0xff] %v1158_v8  ;;  %950 = vst [vmem:[#allocation5 + $0x4f8] sm:$0xff] %v1159_v9  ;;  %v1161_v18 = vadd.f32 -1.0, %v568_v10  ;;  %v1162_v19 = vadd.f32 -1.0, %v569_v11  ;;  %v192_v28 = vld [vmem:[#allocation2 + $0x548] sm:$0xff] }
  0xb8   :  { %v380_v20 = vmul.f32 0.003921569, %v188_v7  ;;  %v381_v21 = vmul.f32 0.003921569, %v189_v12  ;;  %951 = vst [vmem:[#allocation5 + $0x500] sm:$0xff] %v1160_v14  ;;  %v570_v22 = vmul.f32 2.0, %v378_v15 }
  0xb9   :  { %v571_v23 = vmul.f32 2.0, %v379_v16  ;;  %v382_v24 = vmul.f32 0.003921569, %v190_v13  ;;  %v383_v25 = vmul.f32 0.003921569, %v191_v17  ;;  %952 = vst [vmem:[#allocation5 + $0x508] sm:$0xff] %v1161_v18 }
  0xba   :  { %953 = vst [vmem:[#allocation5 + $0x510] sm:$0xff] %v1162_v19  ;;  %v572_v26 = vmul.f32 2.0, %v380_v20  ;;  %v573_v27 = vmul.f32 2.0, %v381_v21  ;;  %v193_v29 = vld [vmem:[#allocation2 + $0x550] sm:$0xff]  ;;  %v194_v30 = vld [vmem:[#allocation2 + $0x558] sm:$0xff]  ;;  %v1163_v31 = vadd.f32 -1.0, %v570_v22 }
  0xbb   :  { %v1164_v32 = vadd.f32 -1.0, %v571_v23  ;;  %v574_v33 = vmul.f32 2.0, %v382_v24  ;;  %v575_v34 = vmul.f32 2.0, %v383_v25  ;;  %v195_v35 = vld [vmem:[#allocation2 + $0x560] sm:$0xff]  ;;  %v196_v36 = vld [vmem:[#allocation2 + $0x568] sm:$0xff]  ;;  %v197_v48 = vld [vmem:[#allocation2 + $0x570] sm:$0xff] }
  0xbc   :  { %v1165_v37 = vadd.f32 -1.0, %v572_v26  ;;  %v1166_v38 = vadd.f32 -1.0, %v573_v27  ;;  %v384_v39 = vmul.f32 0.003921569, %v192_v28  ;;  %v385_v40 = vmul.f32 0.003921569, %v193_v29 }
  0xbd   :  { %954 = vst [vmem:[#allocation5 + $0x518] sm:$0xff] %v1163_v31  ;;  %955 = vst [vmem:[#allocation5 + $0x520] sm:$0xff] %v1164_v32  ;;  %v1167_v41 = vadd.f32 -1.0, %v574_v33  ;;  %v1168_v42 = vadd.f32 -1.0, %v575_v34  ;;  %v386_v43 = vmul.f32 0.003921569, %v194_v30 }
  0xbe   :  { %v387_v44 = vmul.f32 0.003921569, %v195_v35  ;;  %956 = vst [vmem:[#allocation5 + $0x528] sm:$0xff] %v1165_v37  ;;  %957 = vst [vmem:[#allocation5 + $0x530] sm:$0xff] %v1166_v38  ;;  %v576_v45 = vmul.f32 2.0, %v384_v39  ;;  %v577_v46 = vmul.f32 2.0, %v385_v40 }
  0xbf   :  { %v388_v47 = vmul.f32 0.003921569, %v196_v36  ;;  %v198_v49 = vld [vmem:[#allocation2 + $0x578] sm:$0xff]  ;;  %958 = vst [vmem:[#allocation5 + $0x538] sm:$0xff] %v1167_v41  ;;  %959 = vst [vmem:[#allocation5 + $0x540] sm:$0xff] %v1168_v42  ;;  %v578_v50 = vmul.f32 2.0, %v386_v43 }
  0xc0   :  { %v579_v51 = vmul.f32 2.0, %v387_v44  ;;  %v389_v52 = vmul.f32 0.003921569, %v197_v48  ;;  %v390_v53 = vmul.f32 0.003921569, %v198_v49  ;;  %v1169_v54 = vadd.f32 -1.0, %v576_v45 }
  0xc1   :  { %v1170_v55 = vadd.f32 -1.0, %v577_v46  ;;  %v580_v56 = vmul.f32 2.0, %v388_v47  ;;  %v199_v57 = vld [vmem:[#allocation2 + $0x580] sm:$0xff]  ;;  %v200_v58 = vld [vmem:[#allocation2 + $0x588] sm:$0xff]  ;;  %v201_v59 = vld [vmem:[#allocation2 + $0x590] sm:$0xff]  ;;  %v1171_v60 = vadd.f32 -1.0, %v578_v50 }
  0xc2   :  { %v1172_v61 = vadd.f32 -1.0, %v579_v51  ;;  %v581_v62 = vmul.f32 2.0, %v389_v52  ;;  %v582_v63 = vmul.f32 2.0, %v390_v53  ;;  %v202_v0 = vld [vmem:[#allocation2 + $0x598] sm:$0xff]  ;;  %v203_v1 = vld [vmem:[#allocation2 + $0x5a0] sm:$0xff]  ;;  %960 = vst [vmem:[#allocation5 + $0x548] sm:$0xff] %v1169_v54 }
  0xc3   :  { %961 = vst [vmem:[#allocation5 + $0x550] sm:$0xff] %v1170_v55  ;;  %v1173_v2 = vadd.f32 -1.0, %v580_v56  ;;  %v391_v3 = vmul.f32 0.003921569, %v199_v57  ;;  %v392_v4 = vmul.f32 0.003921569, %v200_v58 }
  0xc4   :  { %v204_v5 = vld [vmem:[#allocation2 + $0x5a8] sm:$0xff]  ;;  %962 = vst [vmem:[#allocation5 + $0x558] sm:$0xff] %v1171_v60  ;;  %963 = vst [vmem:[#allocation5 + $0x560] sm:$0xff] %v1172_v61  ;;  %v1174_v6 = vadd.f32 -1.0, %v581_v62  ;;  %v1175_v7 = vadd.f32 -1.0, %v582_v63  ;;  %v205_v16 = vld [vmem:[#allocation2 + $0x5b0] sm:$0xff] }
  0xc5   :  { %v393_v8 = vmul.f32 0.003921569, %v201_v59  ;;  %v394_v9 = vmul.f32 0.003921569, %v202_v0  ;;  %964 = vst [vmem:[#allocation5 + $0x568] sm:$0xff] %v1173_v2  ;;  %v583_v10 = vmul.f32 2.0, %v391_v3 }
  0xc6   :  { %v584_v11 = vmul.f32 2.0, %v392_v4  ;;  %v395_v12 = vmul.f32 0.003921569, %v203_v1  ;;  %v396_v13 = vmul.f32 0.003921569, %v204_v5  ;;  %965 = vst [vmem:[#allocation5 + $0x570] sm:$0xff] %v1174_v6 }
  0xc7   :  { %966 = vst [vmem:[#allocation5 + $0x578] sm:$0xff] %v1175_v7  ;;  %v585_v14 = vmul.f32 2.0, %v393_v8  ;;  %v586_v15 = vmul.f32 2.0, %v394_v9  ;;  %v206_v17 = vld [vmem:[#allocation2 + $0x5b8] sm:$0xff]  ;;  %v207_v18 = vld [vmem:[#allocation2 + $0x5c0] sm:$0xff]  ;;  %v1176_v19 = vadd.f32 -1.0, %v583_v10 }
  0xc8   :  { %v1177_v20 = vadd.f32 -1.0, %v584_v11  ;;  %v587_v21 = vmul.f32 2.0, %v395_v12  ;;  %v588_v22 = vmul.f32 2.0, %v396_v13  ;;  %v208_v23 = vld [vmem:[#allocation2 + $0x5c8] sm:$0xff]  ;;  %v209_v24 = vld [vmem:[#allocation2 + $0x5d0] sm:$0xff]  ;;  %v210_v36 = vld [vmem:[#allocation2 + $0x5d8] sm:$0xff] }
  0xc9   :  { %v1178_v25 = vadd.f32 -1.0, %v585_v14  ;;  %v1179_v26 = vadd.f32 -1.0, %v586_v15  ;;  %v397_v27 = vmul.f32 0.003921569, %v205_v16  ;;  %v398_v28 = vmul.f32 0.003921569, %v206_v17 }
  0xca   :  { %967 = vst [vmem:[#allocation5 + $0x580] sm:$0xff] %v1176_v19  ;;  %968 = vst [vmem:[#allocation5 + $0x588] sm:$0xff] %v1177_v20  ;;  %v1180_v29 = vadd.f32 -1.0, %v587_v21  ;;  %v1181_v30 = vadd.f32 -1.0, %v588_v22  ;;  %v399_v31 = vmul.f32 0.003921569, %v207_v18 }
  0xcb   :  { %v400_v32 = vmul.f32 0.003921569, %v208_v23  ;;  %969 = vst [vmem:[#allocation5 + $0x590] sm:$0xff] %v1178_v25  ;;  %970 = vst [vmem:[#allocation5 + $0x598] sm:$0xff] %v1179_v26  ;;  %v589_v33 = vmul.f32 2.0, %v397_v27  ;;  %v590_v34 = vmul.f32 2.0, %v398_v28 }
  0xcc   :  { %v401_v35 = vmul.f32 0.003921569, %v209_v24  ;;  %v211_v37 = vld [vmem:[#allocation2 + $0x5e0] sm:$0xff]  ;;  %971 = vst [vmem:[#allocation5 + $0x5a0] sm:$0xff] %v1180_v29  ;;  %972 = vst [vmem:[#allocation5 + $0x5a8] sm:$0xff] %v1181_v30  ;;  %v591_v38 = vmul.f32 2.0, %v399_v31 }
  0xcd   :  { %v592_v39 = vmul.f32 2.0, %v400_v32  ;;  %v402_v40 = vmul.f32 0.003921569, %v210_v36  ;;  %v403_v41 = vmul.f32 0.003921569, %v211_v37  ;;  %v1182_v42 = vadd.f32 -1.0, %v589_v33 }
  0xce   :  { %v1183_v43 = vadd.f32 -1.0, %v590_v34  ;;  %v593_v44 = vmul.f32 2.0, %v401_v35  ;;  %v212_v45 = vld [vmem:[#allocation2 + $0x5e8] sm:$0xff]  ;;  %v213_v46 = vld [vmem:[#allocation2 + $0x5f0] sm:$0xff]  ;;  %v214_v47 = vld [vmem:[#allocation2 + $0x5f8] sm:$0xff]  ;;  %v1184_v48 = vadd.f32 -1.0, %v591_v38 }
  0xcf   :  { %v1185_v49 = vadd.f32 -1.0, %v592_v39  ;;  %v594_v50 = vmul.f32 2.0, %v402_v40  ;;  %v595_v51 = vmul.f32 2.0, %v403_v41  ;;  %973 = vst [vmem:[#allocation5 + $0x5b0] sm:$0xff] %v1182_v42  ;;  %v404_v53 = vmul.f32 0.003921569, %v212_v45 }
  0xd0   :  { %974 = vst [vmem:[#allocation5 + $0x5b8] sm:$0xff] %v1183_v43  ;;  %v1186_v52 = vadd.f32 -1.0, %v593_v44  ;;  %v405_v54 = vmul.f32 0.003921569, %v213_v46  ;;  %975 = vst [vmem:[#allocation5 + $0x5c0] sm:$0xff] %v1184_v48  ;;  %s988_s20 = sshll.u32 %s1247_s0, 4  ;;  %s989_s20 = int_to_ptr.vmem [resolvable:$true] %s988_s20 }
  0xd1   :  { %976 = vst [vmem:[#allocation5 + $0x5c8] sm:$0xff] %v1185_v49  ;;  %v1187_v55 = vadd.f32 -1.0, %v594_v50  ;;  %v1188_v56 = vadd.f32 -1.0, %v595_v51  ;;  %v406_v57 = vmul.f32 0.003921569, %v214_v47  ;;  %v596_v58 = vmul.f32 2.0, %v404_v53  ;;  %p1223_p9 = scmp.lt.s32.totalorder %s989_s20, %s989_s20 }
  0xd2   :  { %977 = vst [vmem:[#allocation5 + $0x5d0] sm:$0xff] %v1186_v52  ;;  %v597_v59 = vmul.f32 2.0, %v405_v54  ;;  %s1218_s21 = scalar_lea.vmem %s989_s20, 24576 }
  0xd3   :  { %978 = vst [vmem:[#allocation5 + $0x5d8] sm:$0xff] %v1187_v55  ;;  %979 = vst [vmem:[#allocation5 + $0x5e0] sm:$0xff] %v1188_v56  ;;  %v598_v60 = vmul.f32 2.0, %v406_v57  ;;  %v1189_v61 = vadd.f32 -1.0, %v596_v58  ;;  %p1219_p8 = scmp.ne.s32.totalorder %s989_s20, %s1218_s21  ;;  %p1224_p10 = scmp.lt.s32.totalorder %s1218_s21, %s1218_s21 }
  0xd4   :  { %v1190_v62 = vadd.f32 -1.0, %v597_v59 }
  0xd5   :  { %v1191_v63 = vadd.f32 -1.0, %v598_v60  ;;  %980 = vst [vmem:[#allocation5 + $0x5e8] sm:$0xff] %v1189_v61  ;;  %p1225_p11 = por %p1224_p10, %p1223_p9 }
  0xd6   :  { %981 = vst [vmem:[#allocation5 + $0x5f0] sm:$0xff] %v1190_v62 }
  0xd7   :  { %982 = vst [vmem:[#allocation5 + $0x5f8] sm:$0xff] %v1191_v63  ;;  %p1226_p12 = pnand %p1225_p11, %p1219_p8 }
  0xd9   :  { %1229 = shalt.err (!%p1226_p12)
}
  0xda   :  { %s1230_s24 = scalar_lea.hbm %s1289_s1, 24576 }
  0xdb   :  { %p1231_p13 = scmp.ne.s32.totalorder %s1289_s1, %s1230_s24  ;;  %p1234_p0 = scmp.lt.u32.totalorder %s1230_s24, %s1289_s1 }
  0xdd   :  { %p1236_p1 = pnand %p1234_p0, %p1231_p13 }
  0xdf   :  { %1239 = shalt.err (!%p1236_p1)
}
  0xe0   :  { %994 = dma.vmem_to_hbm [thread:$0]  %s989_s20, 24576, %s1289_s1, [#allocation4], %s1245_s16, %s1245_s16, %s1246_s17  }
  0xe1   :  { %1242 = dma.done.wait [#allocation4], 24576  }
  0xe2   :  { %1243 = vsyncadd [#allocation4], 4294942720 }
  0xe3   :  { %998 = vsyncpa [#allocation3], 1 }
  0xe4   :  { %999 = vsyncpa [#allocation4], 1 }

</bundles_post_ra>
